<compile_context>
chip_gen: v5e
topology: v5e:2x2
jax: 0.10.0
libtpu: 0.0.40
codegen_flags: <defaults>
</compile_context>

<pallas_src>
import functools
import math

import jax
import jax.numpy as jnp
from jax.experimental import pallas as pl
from jax.experimental.pallas import tpu as pltpu

OUT_PAD = 128  # classifier logits padded to a full 128-lane slab (lane-dense store)


# ----------------------------------------------------------------------------
# Kernel
# ----------------------------------------------------------------------------
def _layer_norm(x, gamma, beta, eps=1e-5):
    mu = jnp.mean(x, axis=-1, keepdims=True)
    var = jnp.mean((x - mu) ** 2, axis=-1, keepdims=True)
    return (x - mu) * jax.lax.rsqrt(var + eps) * gamma + beta


def _bf16(x):
    return x.astype(jnp.bfloat16)


def fused_classifier_kernel(
    x_ref,                                   # [TB, T, E]  token+pos embeddings
    ln1_g_ref, ln1_b_ref,                    # [1, E]
    wqkv_ref, bqkv_ref,                      # [E, 3E], [1, 3E]   (fused QKV)
    wo_ref, bo_ref,                          # [E, E],  [1, E]
    ln2_g_ref, ln2_b_ref,                    # [1, E]
    w1_ref, b1_ref,                          # [E, F],  [1, F]
    w2_ref, b2_ref,                          # [F, E],  [1, E]
    fc1_w_ref, fc1_b_ref,                    # [E, H],  [1, H]
    bn_scale_ref, bn_shift_ref,              # [1, H]
    fc2_w_ref, fc2_b_ref,                    # [H, OUT_PAD], [1, OUT_PAD]
    attn_ref,                                # out: [TB, NH, T, T]  (layer squeezed)
    logits_ref,                              # out: [TB, 1, OUT_PAD]
    x_scr,                                   # VMEM scratch [TB*T, E] f32 (carry)
    *, num_heads):
    layer = pl.program_id(1)
    n_layers = pl.num_programs(1)

    TB, T, E = x_ref.shape
    BT = TB * T
    Dh = E // num_heads
    scale = 1.0 / math.sqrt(Dh)
    f32 = jnp.float32

    # Load embeddings into the VMEM-resident activation carry at layer 0.
    @pl.when(layer == 0)
    def _():
        x_scr[...] = x_ref[...].reshape(BT, E)

    x = x_scr[...]                                            # [BT, E] f32

    # ---------------- multi-head self-attention (pre-LN) ----------------
    xn = _layer_norm(x, ln1_g_ref[...], ln1_b_ref[...])
    qkv = jnp.dot(_bf16(xn), _bf16(wqkv_ref[...]),            # one wide MXU push
                  preferred_element_type=f32) + bqkv_ref[...]
    q = qkv[:, 0 * E:1 * E].reshape(TB, T, E)
    k = qkv[:, 1 * E:2 * E].reshape(TB, T, E)
    v = qkv[:, 2 * E:3 * E].reshape(TB, T, E)

    wo = wo_ref[...]
    attn_out = jnp.zeros((BT, E), f32)
    for h in range(num_heads):   # static unroll; no concatenate / stack relayouts
        sl = slice(h * Dh, (h + 1) * Dh)
        qh, kh, vh = _bf16(q[:, :, sl]), _bf16(k[:, :, sl]), _bf16(v[:, :, sl])
        s = jnp.einsum('bqd,bkd->bqk', qh, kh,
                       preferred_element_type=f32) * scale    # [TB, T, T]
        s = s - jnp.max(s, axis=-1, keepdims=True)
        p = jnp.exp(s)
        denom = jnp.sum(p, axis=-1, keepdims=True)
        p = p * pl.reciprocal(denom, approx=True)             # EUP slot, frees VALU
        attn_ref[:, h:h + 1, :, :] = p.reshape(TB, 1, T, T)   # direct per-head store
        ctx = jnp.einsum('bqk,bkd->bqd', _bf16(p), vh,
                         preferred_element_type=f32)          # [TB, T, Dh]
        # output projection fused per head: ctx @ Wo == sum_h ctx_h @ Wo[rows_h]
        attn_out = attn_out + jnp.dot(_bf16(ctx.reshape(BT, Dh)),
                                      _bf16(wo[sl, :]),
                                      preferred_element_type=f32)
    x = x + attn_out + bo_ref[...]                            # residual (f32)

    # ---------------- feed-forward (pre-LN) ----------------
    xn2 = _layer_norm(x, ln2_g_ref[...], ln2_b_ref[...])
    hmid = jnp.dot(_bf16(xn2), _bf16(w1_ref[...]),
                   preferred_element_type=f32) + b1_ref[...]
    hmid = jnp.maximum(hmid, 0.0)
    ff = jnp.dot(_bf16(hmid), _bf16(w2_ref[...]),
                 preferred_element_type=f32) + b2_ref[...]
    x = x + ff                                                # residual (f32)
    x_scr[...] = x                                            # carry to next layer

    # -------- classifier head: fused epilogue on the last layer --------
    @pl.when(layer == n_layers - 1)
    def _():
        pooled = jnp.mean(x.reshape(TB, T, E), axis=1)        # torch.mean(dim=1)
        h1 = jnp.dot(_bf16(pooled), _bf16(fc1_w_ref[...]),
                     preferred_element_type=f32) + fc1_b_ref[...]       # fc_1
        h1 = h1 * bn_scale_ref[...] + bn_shift_ref[...]       # BatchNorm1d (eval)
        h1 = jnp.maximum(h1, 0.0)                             # ReLU; dropout = id
        logits = jnp.dot(_bf16(h1), _bf16(fc2_w_ref[...]),
                         preferred_element_type=f32) + fc2_b_ref[...]   # fc_2
        logits_ref[...] = logits.reshape(TB, 1, logits_ref.shape[-1])


# ----------------------------------------------------------------------------
# Wrapper (single pallas_call for the whole forward pass)
# ----------------------------------------------------------------------------
def fused_classifier(x_emb, params, *, n_head, batch_tile=1):
    B, T, E = x_emb.shape
    L = params['wqkv'].shape[0]
    F = params['w1'].shape[2]
    HID = params['fc1_w'].shape[1]
    assert B % batch_tile == 0
    TB = batch_tile
    nb = B // TB
    grid = (nb, L)   # (parallel batch tiles, arbitrary layer axis)

    def lspec(*rest):   # per-layer stacked weight: leading layer dim squeezed
        nd = len(rest)
        return pl.BlockSpec((None,) + rest, lambda b, l, nd=nd: (l,) + (0,) * nd)

    def fspec(*shape):  # full-array (head / shared) weight
        nd = len(shape)
        return pl.BlockSpec(shape, lambda b, l, nd=nd: (0,) * nd)

    in_specs = [
        pl.BlockSpec((TB, T, E), lambda b, l: (b, 0, 0)),     # embeddings
        lspec(1, E), lspec(1, E),                             # ln1 gamma/beta
        lspec(E, 3 * E), lspec(1, 3 * E),                     # fused QKV
        lspec(E, E), lspec(1, E),                             # attn out proj
        lspec(1, E), lspec(1, E),                             # ln2 gamma/beta
        lspec(E, F), lspec(1, F),                             # ffn w1/b1
        lspec(F, E), lspec(1, E),                             # ffn w2/b2
        fspec(E, HID), fspec(1, HID),                         # fc_1
        fspec(1, HID), fspec(1, HID),                         # bn scale/shift
        fspec(HID, OUT_PAD), fspec(1, OUT_PAD),               # fc_2 (lane-padded)
    ]
    out_specs = (
        pl.BlockSpec((None, TB, n_head, T, T), lambda b, l: (l, b, 0, 0, 0)),
        pl.BlockSpec((TB, 1, OUT_PAD), lambda b, l: (b, 0, 0)),
    )
    out_shape = (
        jax.ShapeDtypeStruct((L, B, n_head, T, T), jnp.float32),
        jax.ShapeDtypeStruct((B, 1, OUT_PAD), jnp.float32),
    )

    attn, logits = pl.pallas_call(
        functools.partial(fused_classifier_kernel, num_heads=n_head),
        grid=grid,
        in_specs=in_specs,
        out_specs=out_specs,
        out_shape=out_shape,
        scratch_shapes=[pltpu.VMEM((TB * T, E), jnp.float32)],
        compiler_params=pltpu.CompilerParams(
            dimension_semantics=("parallel", "arbitrary")),
    )(x_emb,
      params['ln1_g'], params['ln1_b'],
      params['wqkv'], params['bqkv'],
      params['wo'], params['bo'],
      params['ln2_g'], params['ln2_b'],
      params['w1'], params['b1'],
      params['w2'], params['b2'],
      params['fc1_w'], params['fc1_b'],
      params['bn_scale'], params['bn_shift'],
      params['fc2_w'], params['fc2_b'])
    return logits[:, 0, :], attn


def classifier_forward(params, tokens, *, n_head, batch_tile=1):
    """tokens int32 [B, T] -> (logits [B, n_output], attn [L, B, H, T, T])."""
    B, T = tokens.shape
    # TODO(synk): embedding lookup is a data-dependent gather; done in plain JAX.
    x = params['tok_emb'][tokens] + params['pos_emb'][:T][None, :, :]
    logits_pad, attn = fused_classifier(x, params, n_head=n_head,
                                        batch_tile=batch_tile)
    return logits_pad[:, :params['n_output']], attn


# ----------------------------------------------------------------------------
# Parameter init (matches _init_weights: Linear/Embedding ~ N(0, 0.02), bias 0)
# ----------------------------------------------------------------------------
def init_params(key, *, n_embd, n_head, n_layer, vocab_size, block_size,
                n_input, n_hidden, n_output, batch_norm, expansion=4):
    E, F, HID = n_embd, expansion * n_embd, n_hidden
    ks = jax.random.split(key, 8)

    def nrm(k, shape):
        return 0.02 * jax.random.normal(k, shape, dtype=jnp.float32)

    fc2_w = jnp.zeros((HID, OUT_PAD), jnp.float32)
    fc2_w = fc2_w.at[:, :n_output].set(nrm(ks[7], (HID, n_output)))

    params = {
        'tok_emb': nrm(ks[0], (vocab_size, E)),
        'pos_emb': nrm(ks[1], (block_size, E)),
        # per-layer weights stacked along a leading layer axis
        'ln1_g': jnp.ones((n_layer, 1, E), jnp.float32),
        'ln1_b': jnp.zeros((n_layer, 1, E), jnp.float32),
        'wqkv': nrm(ks[2], (n_layer, E, 3 * E)),
        'bqkv': jnp.zeros((n_layer, 1, 3 * E), jnp.float32),
        'wo': nrm(ks[3], (n_layer, E, E)),
        'bo': jnp.zeros((n_layer, 1, E), jnp.float32),
        'ln2_g': jnp.ones((n_layer, 1, E), jnp.float32),
        'ln2_b': jnp.zeros((n_layer, 1, E), jnp.float32),
        'w1': nrm(ks[4], (n_layer, E, F)),
        'b1': jnp.zeros((n_layer, 1, F), jnp.float32),
        'w2': nrm(ks[5], (n_layer, F, E)),
        'b2': jnp.zeros((n_layer, 1, E), jnp.float32),
        # classifier head (n_input must equal E, as in the PyTorch module usage)
        'fc1_w': nrm(ks[6], (n_input, HID)),
        'fc1_b': jnp.zeros((1, HID), jnp.float32),
        'fc2_w': fc2_w,
        'fc2_b': jnp.zeros((1, OUT_PAD), jnp.float32),
        'n_output': n_output,
    }
    # BatchNorm1d eval mode: y = (x - 0) / sqrt(1 + eps); identity when disabled.
    if batch_norm:
        params['bn_scale'] = jnp.full((1, HID), 1.0 / math.sqrt(1.0 + 1e-5),
                                      jnp.float32)
    else:
        params['bn_scale'] = jnp.ones((1, HID), jnp.float32)
    params['bn_shift'] = jnp.zeros((1, HID), jnp.float32)
    return params


# ----------------------------------------------------------------------------
if __name__ == "__main__":
    # small, module-consistent shapes
    n_embd, n_head, n_layer = 32, 2, 2
    block_size, vocab_size = 8, 64
    n_input, n_hidden, n_output = n_embd, 32, 3
    batch_norm = False
    batch = 2

    key = jax.random.PRNGKey(0)
    pkey, xkey = jax.random.split(key)

    params = init_params(
        pkey, n_embd=n_embd, n_head=n_head, n_layer=n_layer,
        vocab_size=vocab_size, block_size=block_size,
        n_input=n_input, n_hidden=n_hidden, n_output=n_output,
        batch_norm=batch_norm)

    tokens = jax.random.randint(xkey, (batch, block_size), 0, vocab_size,
                                dtype=jnp.int32)

    out, attn_w = classifier_forward(params, tokens, n_head=n_head, batch_tile=1)
    jax.block_until_ready((out, attn_w))

    assert out.shape == (batch, n_output)
    assert attn_w.shape == (n_layer, batch, n_head, block_size, block_size)
    # attention rows are softmax-normalized (approx reciprocal -> loose tol)
    assert jnp.allclose(jnp.sum(attn_w, axis=-1), 1.0, atol=5e-2)
    print("KERNEL_OK")
</pallas_src>

<mosaic_0001>
module attributes {stable_mosaic.version = 11 : i64} {
  func.func @fused_classifier_kernel(%arg0: i32, %arg1: i32, %arg2: memref<1x8x32xf32, #tpu.memory_space<vmem>>, %arg3: memref<1x1x32xf32, #tpu.memory_space<vmem>>, %arg4: memref<1x1x32xf32, #tpu.memory_space<vmem>>, %arg5: memref<1x32x96xf32, #tpu.memory_space<vmem>>, %arg6: memref<1x1x96xf32, #tpu.memory_space<vmem>>, %arg7: memref<1x32x32xf32, #tpu.memory_space<vmem>>, %arg8: memref<1x1x32xf32, #tpu.memory_space<vmem>>, %arg9: memref<1x1x32xf32, #tpu.memory_space<vmem>>, %arg10: memref<1x1x32xf32, #tpu.memory_space<vmem>>, %arg11: memref<1x32x128xf32, #tpu.memory_space<vmem>>, %arg12: memref<1x1x128xf32, #tpu.memory_space<vmem>>, %arg13: memref<1x128x32xf32, #tpu.memory_space<vmem>>, %arg14: memref<1x1x32xf32, #tpu.memory_space<vmem>>, %arg15: memref<32x32xf32, #tpu.memory_space<vmem>>, %arg16: memref<1x32xf32, #tpu.memory_space<vmem>>, %arg17: memref<1x32xf32, #tpu.memory_space<vmem>>, %arg18: memref<1x32xf32, #tpu.memory_space<vmem>>, %arg19: memref<32x128xf32, #tpu.memory_space<vmem>>, %arg20: memref<1x128xf32, #tpu.memory_space<vmem>>, %arg21: memref<1x1x2x8x8xf32, #tpu.memory_space<vmem>>, %arg22: memref<1x1x128xf32, #tpu.memory_space<vmem>>, %arg23: memref<8x32xf32, #tpu.memory_space<vmem>>) attributes {dimension_semantics = [#tpu.dimension_semantics<parallel>, #tpu.dimension_semantics<arbitrary>], iteration_bounds = array<i64: 2, 2>, scalar_prefetch = 0 : i64, scratch_operands = 1 : i64, tpu.core_type = #tpu.core_type<tc>, window_params = [{transform_indices = @transform_0, window_bounds = array<i64: 1, 8, 32>}, {transform_indices = @transform_1, window_bounds = array<i64: 1, 1, 32>}, {transform_indices = @transform_2, window_bounds = array<i64: 1, 1, 32>}, {transform_indices = @transform_3, window_bounds = array<i64: 1, 32, 96>}, {transform_indices = @transform_4, window_bounds = array<i64: 1, 1, 96>}, {transform_indices = @transform_5, window_bounds = array<i64: 1, 32, 32>}, {transform_indices = @transform_6, window_bounds = array<i64: 1, 1, 32>}, {transform_indices = @transform_7, window_bounds = array<i64: 1, 1, 32>}, {transform_indices = @transform_8, window_bounds = array<i64: 1, 1, 32>}, {transform_indices = @transform_9, window_bounds = array<i64: 1, 32, 128>}, {transform_indices = @transform_10, window_bounds = array<i64: 1, 1, 128>}, {transform_indices = @transform_11, window_bounds = array<i64: 1, 128, 32>}, {transform_indices = @transform_12, window_bounds = array<i64: 1, 1, 32>}, {pipeline_mode = #tpu.pipeline_mode<synchronous>, transform_indices = @transform_13, window_bounds = array<i64: 32, 32>}, {pipeline_mode = #tpu.pipeline_mode<synchronous>, transform_indices = @transform_14, window_bounds = array<i64: 1, 32>}, {pipeline_mode = #tpu.pipeline_mode<synchronous>, transform_indices = @transform_15, window_bounds = array<i64: 1, 32>}, {pipeline_mode = #tpu.pipeline_mode<synchronous>, transform_indices = @transform_16, window_bounds = array<i64: 1, 32>}, {pipeline_mode = #tpu.pipeline_mode<synchronous>, transform_indices = @transform_17, window_bounds = array<i64: 32, 128>}, {pipeline_mode = #tpu.pipeline_mode<synchronous>, transform_indices = @transform_18, window_bounds = array<i64: 1, 128>}, {transform_indices = @transform_19, window_bounds = array<i64: 1, 1, 2, 8, 8>}, {transform_indices = @transform_20, window_bounds = array<i64: 1, 1, 128>}]} {
    %c0_i32 = arith.constant 0 : i32
    %0 = arith.cmpi eq, %arg1, %c0_i32 : i32
    %1 = arith.extui %0 : i1 to i32
    %c0_i32_0 = arith.constant 0 : i32
    %2 = arith.cmpi ne, %1, %c0_i32_0 : i32
    scf.if %2 {
      %c0_76 = arith.constant 0 : index
      %c0_77 = arith.constant 0 : index
      %c0_78 = arith.constant 0 : index
      %166 = vector.load %arg2[%c0_76, %c0_77, %c0_78] : memref<1x8x32xf32, #tpu.memory_space<vmem>>, vector<1x8x32xf32>
      %167 = vector.shape_cast %166 : vector<1x8x32xf32> to vector<8x32xf32>
      %c0_79 = arith.constant 0 : index
      %c0_80 = arith.constant 0 : index
      %168 = vector.load %arg23[%c0_79, %c0_80] : memref<8x32xf32, #tpu.memory_space<vmem>>, vector<8x32xf32>
      tpu.vector_store %arg23[%c0_79, %c0_80], %167 {strides = array<i32>} : memref<8x32xf32, #tpu.memory_space<vmem>>, vector<8x32xf32>,
    } else {
    }
    %c0 = arith.constant 0 : index
    %c0_1 = arith.constant 0 : index
    %3 = vector.load %arg23[%c0, %c0_1] : memref<8x32xf32, #tpu.memory_space<vmem>>, vector<8x32xf32>
    %c0_2 = arith.constant 0 : index
    %c0_3 = arith.constant 0 : index
    %c0_4 = arith.constant 0 : index
    %4 = vector.load %arg3[%c0_2, %c0_3, %c0_4] : memref<1x1x32xf32, #tpu.memory_space<vmem>>, vector<1x1x32xf32>
    %5 = vector.shape_cast %4 : vector<1x1x32xf32> to vector<1x32xf32>
    %c0_5 = arith.constant 0 : index
    %c0_6 = arith.constant 0 : index
    %c0_7 = arith.constant 0 : index
    %6 = vector.load %arg4[%c0_5, %c0_6, %c0_7] : memref<1x1x32xf32, #tpu.memory_space<vmem>>, vector<1x1x32xf32>
    %7 = vector.shape_cast %6 : vector<1x1x32xf32> to vector<1x32xf32>
    %cst = arith.constant dense<0.000000e+00> : vector<8xf32>
    %8 = vector.multi_reduction <add>, %3, %cst [1] : vector<8x32xf32> to vector<8xf32>
    %9 = vector.shape_cast %8 : vector<8xf32> to vector<8x1xf32>
    %cst_8 = arith.constant 3.200000e+01 : f32
    %10 = vector.broadcast %cst_8 : f32 to vector<8x1xf32>
    %11 = arith.divf %9, %10 : vector<8x1xf32>
    %12 = vector.broadcast %11 : vector<8x1xf32> to vector<8x32xf32>
    %13 = arith.subf %3, %12 : vector<8x32xf32>
    %14 = arith.mulf %13, %13 : vector<8x32xf32>
    %cst_9 = arith.constant dense<0.000000e+00> : vector<8xf32>
    %15 = vector.multi_reduction <add>, %14, %cst_9 [1] : vector<8x32xf32> to vector<8xf32>
    %16 = vector.shape_cast %15 : vector<8xf32> to vector<8x1xf32>
    %cst_10 = arith.constant 3.200000e+01 : f32
    %17 = vector.broadcast %cst_10 : f32 to vector<8x1xf32>
    %18 = arith.divf %16, %17 : vector<8x1xf32>
    %19 = vector.broadcast %11 : vector<8x1xf32> to vector<8x32xf32>
    %20 = arith.subf %3, %19 : vector<8x32xf32>
    %cst_11 = arith.constant 9.99999974E-6 : f32
    %21 = vector.broadcast %cst_11 : f32 to vector<8x1xf32>
    %22 = arith.addf %18, %21 : vector<8x1xf32>
    %23 = math.rsqrt %22 : vector<8x1xf32>
    %24 = vector.broadcast %23 : vector<8x1xf32> to vector<8x32xf32>
    %25 = arith.mulf %20, %24 : vector<8x32xf32>
    %26 = vector.broadcast %5 : vector<1x32xf32> to vector<8x32xf32>
    %27 = arith.mulf %25, %26 : vector<8x32xf32>
    %28 = vector.broadcast %7 : vector<1x32xf32> to vector<8x32xf32>
    %29 = arith.addf %27, %28 : vector<8x32xf32>
    %30 = arith.truncf %29 : vector<8x32xf32> to vector<8x32xbf16>
    %c0_12 = arith.constant 0 : index
    %c0_13 = arith.constant 0 : index
    %c0_14 = arith.constant 0 : index
    %31 = vector.load %arg5[%c0_12, %c0_13, %c0_14] : memref<1x32x96xf32, #tpu.memory_space<vmem>>, vector<1x32x96xf32>
    %32 = vector.shape_cast %31 : vector<1x32x96xf32> to vector<32x96xf32>
    %33 = arith.truncf %32 : vector<32x96xf32> to vector<32x96xbf16>
    %cst_15 = arith.constant dense<0.000000e+00> : vector<8x96xf32>
    %34 = tpu.matmul %30, %33, %cst_15 {dimension_numbers = #tpu.dot_dimension_numbers<[1], [0], [0], [1], [0, 0, 1, 1], [], []>} : vector<8x32xbf16>, vector<32x96xbf16>, vector<8x96xf32> -> vector<8x96xf32>
    %c0_16 = arith.constant 0 : index
    %c0_17 = arith.constant 0 : index
    %c0_18 = arith.constant 0 : index
    %35 = vector.load %arg6[%c0_16, %c0_17, %c0_18] : memref<1x1x96xf32, #tpu.memory_space<vmem>>, vector<1x1x96xf32>
    %36 = vector.shape_cast %35 : vector<1x1x96xf32> to vector<1x96xf32>
    %37 = vector.broadcast %36 : vector<1x96xf32> to vector<8x96xf32>
    %38 = arith.addf %34, %37 : vector<8x96xf32>
    %39 = vector.extract_strided_slice %38 {offsets = [0, 0], sizes = [8, 32], strides = [1, 1]} : vector<8x96xf32> to vector<8x32xf32>
    %40 = vector.shape_cast %39 : vector<8x32xf32> to vector<1x8x32xf32>
    %41 = vector.extract_strided_slice %38 {offsets = [0, 32], sizes = [8, 32], strides = [1, 1]} : vector<8x96xf32> to vector<8x32xf32>
    %42 = vector.shape_cast %41 : vector<8x32xf32> to vector<1x8x32xf32>
    %43 = vector.extract_strided_slice %38 {offsets = [0, 64], sizes = [8, 32], strides = [1, 1]} : vector<8x96xf32> to vector<8x32xf32>
    %44 = vector.shape_cast %43 : vector<8x32xf32> to vector<1x8x32xf32>
    %c0_19 = arith.constant 0 : index
    %c0_20 = arith.constant 0 : index
    %c0_21 = arith.constant 0 : index
    %45 = vector.load %arg7[%c0_19, %c0_20, %c0_21] : memref<1x32x32xf32, #tpu.memory_space<vmem>>, vector<1x32x32xf32>
    %46 = vector.shape_cast %45 : vector<1x32x32xf32> to vector<32x32xf32>
    %cst_22 = arith.constant 0.000000e+00 : f32
    %47 = vector.broadcast %cst_22 : f32 to vector<8x32xf32>
    %48 = vector.extract_strided_slice %40 {offsets = [0, 0, 0], sizes = [1, 8, 16], strides = [1, 1, 1]} : vector<1x8x32xf32> to vector<1x8x16xf32>
    %49 = arith.truncf %48 : vector<1x8x16xf32> to vector<1x8x16xbf16>
    %50 = vector.extract_strided_slice %42 {offsets = [0, 0, 0], sizes = [1, 8, 16], strides = [1, 1, 1]} : vector<1x8x32xf32> to vector<1x8x16xf32>
    %51 = arith.truncf %50 : vector<1x8x16xf32> to vector<1x8x16xbf16>
    %52 = vector.extract_strided_slice %44 {offsets = [0, 0, 0], sizes = [1, 8, 16], strides = [1, 1, 1]} : vector<1x8x32xf32> to vector<1x8x16xf32>
    %53 = arith.truncf %52 : vector<1x8x16xf32> to vector<1x8x16xbf16>
    "tpu.trace_start"() <{level = 10 : i32, message = "bqd,bkd->bqk"}> : () -> ()
    %cst_23 = arith.constant dense<0.000000e+00> : vector<1x8x8xf32>
    %54 = tpu.matmul %49, %51, %cst_23 {dimension_numbers = #tpu.dot_dimension_numbers<[2], [2], [1], [1], [0, 0, 0, 1, 1, 1], [0], [0]>} : vector<1x8x16xbf16>, vector<1x8x16xbf16>, vector<1x8x8xf32> -> vector<1x8x8xf32>
    "tpu.trace_stop"() : () -> ()
    %cst_24 = arith.constant 2.500000e-01 : f32
    %55 = vector.broadcast %cst_24 : f32 to vector<1x8x8xf32>
    %56 = arith.mulf %54, %55 : vector<1x8x8xf32>
    %cst_25 = arith.constant dense<0xFF800000> : vector<1x8xf32>
    %57 = vector.multi_reduction <maximumf>, %56, %cst_25 [2] : vector<1x8x8xf32> to vector<1x8xf32>
    %58 = vector.shape_cast %57 : vector<1x8xf32> to vector<1x8x1xf32>
    %59 = vector.broadcast %58 : vector<1x8x1xf32> to vector<1x8x8xf32>
    %60 = arith.subf %56, %59 : vector<1x8x8xf32>
    %61 = math.exp %60 : vector<1x8x8xf32>
    %cst_26 = arith.constant dense<0.000000e+00> : vector<1x8xf32>
    %62 = vector.multi_reduction <add>, %61, %cst_26 [2] : vector<1x8x8xf32> to vector<1x8xf32>
    %63 = vector.shape_cast %62 : vector<1x8xf32> to vector<1x8x1xf32>
    %64 = tpu.reciprocal %63 {approx = true} : vector<1x8x1xf32> -> vector<1x8x1xf32>
    %65 = vector.broadcast %64 : vector<1x8x1xf32> to vector<1x8x8xf32>
    %66 = arith.mulf %61, %65 : vector<1x8x8xf32>
    %67 = vector.shape_cast %66 : vector<1x8x8xf32> to vector<1x1x8x8xf32>
    %c0_27 = arith.constant 0 : index
    %c0_28 = arith.constant 0 : index
    %c0_29 = arith.constant 0 : index
    %c0_30 = arith.constant 0 : index
    %c0_31 = arith.constant 0 : index
    %68 = vector.load %arg21[%c0_27, %c0_28, %c0_29, %c0_30, %c0_31] : memref<1x1x2x8x8xf32, #tpu.memory_space<vmem>>, vector<1x1x1x8x8xf32>
    %69 = vector.shape_cast %68 : vector<1x1x1x8x8xf32> to vector<1x1x8x8xf32>
    %70 = vector.shape_cast %67 : vector<1x1x8x8xf32> to vector<1x1x1x8x8xf32>
    tpu.vector_store %arg21[%c0_27, %c0_28, %c0_29, %c0_30, %c0_31], %70 {strides = array<i32>} : memref<1x1x2x8x8xf32, #tpu.memory_space<vmem>>, vector<1x1x1x8x8xf32>,
    %71 = arith.truncf %66 : vector<1x8x8xf32> to vector<1x8x8xbf16>
    "tpu.trace_start"() <{level = 10 : i32, message = "bqk,bkd->bqd"}> : () -> ()
    %cst_32 = arith.constant dense<0.000000e+00> : vector<1x8x16xf32>
    %72 = tpu.matmul %71, %53, %cst_32 {dimension_numbers = #tpu.dot_dimension_numbers<[2], [1], [1], [2], [0, 0, 0, 1, 1, 2], [0], [0]>} : vector<1x8x8xbf16>, vector<1x8x16xbf16>, vector<1x8x16xf32> -> vector<1x8x16xf32>
    "tpu.trace_stop"() : () -> ()
    %73 = vector.shape_cast %72 : vector<1x8x16xf32> to vector<8x16xf32>
    %74 = arith.truncf %73 : vector<8x16xf32> to vector<8x16xbf16>
    %75 = vector.extract_strided_slice %46 {offsets = [0, 0], sizes = [16, 32], strides = [1, 1]} : vector<32x32xf32> to vector<16x32xf32>
    %76 = arith.truncf %75 : vector<16x32xf32> to vector<16x32xbf16>
    %cst_33 = arith.constant dense<0.000000e+00> : vector<8x32xf32>
    %77 = tpu.matmul %74, %76, %cst_33 {dimension_numbers = #tpu.dot_dimension_numbers<[1], [0], [0], [1], [0, 0, 1, 1], [], []>} : vector<8x16xbf16>, vector<16x32xbf16>, vector<8x32xf32> -> vector<8x32xf32>
    %78 = arith.addf %47, %77 : vector<8x32xf32>
    %79 = vector.extract_strided_slice %40 {offsets = [0, 0, 16], sizes = [1, 8, 16], strides = [1, 1, 1]} : vector<1x8x32xf32> to vector<1x8x16xf32>
    %80 = arith.truncf %79 : vector<1x8x16xf32> to vector<1x8x16xbf16>
    %81 = vector.extract_strided_slice %42 {offsets = [0, 0, 16], sizes = [1, 8, 16], strides = [1, 1, 1]} : vector<1x8x32xf32> to vector<1x8x16xf32>
    %82 = arith.truncf %81 : vector<1x8x16xf32> to vector<1x8x16xbf16>
    %83 = vector.extract_strided_slice %44 {offsets = [0, 0, 16], sizes = [1, 8, 16], strides = [1, 1, 1]} : vector<1x8x32xf32> to vector<1x8x16xf32>
    %84 = arith.truncf %83 : vector<1x8x16xf32> to vector<1x8x16xbf16>
    "tpu.trace_start"() <{level = 10 : i32, message = "bqd,bkd->bqk"}> : () -> ()
    %cst_34 = arith.constant dense<0.000000e+00> : vector<1x8x8xf32>
    %85 = tpu.matmul %80, %82, %cst_34 {dimension_numbers = #tpu.dot_dimension_numbers<[2], [2], [1], [1], [0, 0, 0, 1, 1, 1], [0], [0]>} : vector<1x8x16xbf16>, vector<1x8x16xbf16>, vector<1x8x8xf32> -> vector<1x8x8xf32>
    "tpu.trace_stop"() : () -> ()
    %cst_35 = arith.constant 2.500000e-01 : f32
    %86 = vector.broadcast %cst_35 : f32 to vector<1x8x8xf32>
    %87 = arith.mulf %85, %86 : vector<1x8x8xf32>
    %cst_36 = arith.constant dense<0xFF800000> : vector<1x8xf32>
    %88 = vector.multi_reduction <maximumf>, %87, %cst_36 [2] : vector<1x8x8xf32> to vector<1x8xf32>
    %89 = vector.shape_cast %88 : vector<1x8xf32> to vector<1x8x1xf32>
    %90 = vector.broadcast %89 : vector<1x8x1xf32> to vector<1x8x8xf32>
    %91 = arith.subf %87, %90 : vector<1x8x8xf32>
    %92 = math.exp %91 : vector<1x8x8xf32>
    %cst_37 = arith.constant dense<0.000000e+00> : vector<1x8xf32>
    %93 = vector.multi_reduction <add>, %92, %cst_37 [2] : vector<1x8x8xf32> to vector<1x8xf32>
    %94 = vector.shape_cast %93 : vector<1x8xf32> to vector<1x8x1xf32>
    %95 = tpu.reciprocal %94 {approx = true} : vector<1x8x1xf32> -> vector<1x8x1xf32>
    %96 = vector.broadcast %95 : vector<1x8x1xf32> to vector<1x8x8xf32>
    %97 = arith.mulf %92, %96 : vector<1x8x8xf32>
    %98 = vector.shape_cast %97 : vector<1x8x8xf32> to vector<1x1x8x8xf32>
    %c0_38 = arith.constant 0 : index
    %c0_39 = arith.constant 0 : index
    %c1 = arith.constant 1 : index
    %c0_40 = arith.constant 0 : index
    %c0_41 = arith.constant 0 : index
    %99 = vector.load %arg21[%c0_38, %c0_39, %c1, %c0_40, %c0_41] : memref<1x1x2x8x8xf32, #tpu.memory_space<vmem>>, vector<1x1x1x8x8xf32>
    %100 = vector.shape_cast %99 : vector<1x1x1x8x8xf32> to vector<1x1x8x8xf32>
    %101 = vector.shape_cast %98 : vector<1x1x8x8xf32> to vector<1x1x1x8x8xf32>
    tpu.vector_store %arg21[%c0_38, %c0_39, %c1, %c0_40, %c0_41], %101 {strides = array<i32>} : memref<1x1x2x8x8xf32, #tpu.memory_space<vmem>>, vector<1x1x1x8x8xf32>,
    %102 = arith.truncf %97 : vector<1x8x8xf32> to vector<1x8x8xbf16>
    "tpu.trace_start"() <{level = 10 : i32, message = "bqk,bkd->bqd"}> : () -> ()
    %cst_42 = arith.constant dense<0.000000e+00> : vector<1x8x16xf32>
    %103 = tpu.matmul %102, %84, %cst_42 {dimension_numbers = #tpu.dot_dimension_numbers<[2], [1], [1], [2], [0, 0, 0, 1, 1, 2], [0], [0]>} : vector<1x8x8xbf16>, vector<1x8x16xbf16>, vector<1x8x16xf32> -> vector<1x8x16xf32>
    "tpu.trace_stop"() : () -> ()
    %104 = vector.shape_cast %103 : vector<1x8x16xf32> to vector<8x16xf32>
    %105 = arith.truncf %104 : vector<8x16xf32> to vector<8x16xbf16>
    %106 = vector.extract_strided_slice %46 {offsets = [16, 0], sizes = [16, 32], strides = [1, 1]} : vector<32x32xf32> to vector<16x32xf32>
    %107 = arith.truncf %106 : vector<16x32xf32> to vector<16x32xbf16>
    %cst_43 = arith.constant dense<0.000000e+00> : vector<8x32xf32>
    %108 = tpu.matmul %105, %107, %cst_43 {dimension_numbers = #tpu.dot_dimension_numbers<[1], [0], [0], [1], [0, 0, 1, 1], [], []>} : vector<8x16xbf16>, vector<16x32xbf16>, vector<8x32xf32> -> vector<8x32xf32>
    %109 = arith.addf %78, %108 : vector<8x32xf32>
    %110 = arith.addf %3, %109 : vector<8x32xf32>
    %c0_44 = arith.constant 0 : index
    %c0_45 = arith.constant 0 : index
    %c0_46 = arith.constant 0 : index
    %111 = vector.load %arg8[%c0_44, %c0_45, %c0_46] : memref<1x1x32xf32, #tpu.memory_space<vmem>>, vector<1x1x32xf32>
    %112 = vector.shape_cast %111 : vector<1x1x32xf32> to vector<1x32xf32>
    %113 = vector.broadcast %112 : vector<1x32xf32> to vector<8x32xf32>
    %114 = arith.addf %110, %113 : vector<8x32xf32>
    %c0_47 = arith.constant 0 : index
    %c0_48 = arith.constant 0 : index
    %c0_49 = arith.constant 0 : index
    %115 = vector.load %arg9[%c0_47, %c0_48, %c0_49] : memref<1x1x32xf32, #tpu.memory_space<vmem>>, vector<1x1x32xf32>
    %116 = vector.shape_cast %115 : vector<1x1x32xf32> to vector<1x32xf32>
    %c0_50 = arith.constant 0 : index
    %c0_51 = arith.constant 0 : index
    %c0_52 = arith.constant 0 : index
    %117 = vector.load %arg10[%c0_50, %c0_51, %c0_52] : memref<1x1x32xf32, #tpu.memory_space<vmem>>, vector<1x1x32xf32>
    %118 = vector.shape_cast %117 : vector<1x1x32xf32> to vector<1x32xf32>
    %cst_53 = arith.constant dense<0.000000e+00> : vector<8xf32>
    %119 = vector.multi_reduction <add>, %114, %cst_53 [1] : vector<8x32xf32> to vector<8xf32>
    %120 = vector.shape_cast %119 : vector<8xf32> to vector<8x1xf32>
    %cst_54 = arith.constant 3.200000e+01 : f32
    %121 = vector.broadcast %cst_54 : f32 to vector<8x1xf32>
    %122 = arith.divf %120, %121 : vector<8x1xf32>
    %123 = vector.broadcast %122 : vector<8x1xf32> to vector<8x32xf32>
    %124 = arith.subf %114, %123 : vector<8x32xf32>
    %125 = arith.mulf %124, %124 : vector<8x32xf32>
    %cst_55 = arith.constant dense<0.000000e+00> : vector<8xf32>
    %126 = vector.multi_reduction <add>, %125, %cst_55 [1] : vector<8x32xf32> to vector<8xf32>
    %127 = vector.shape_cast %126 : vector<8xf32> to vector<8x1xf32>
    %cst_56 = arith.constant 3.200000e+01 : f32
    %128 = vector.broadcast %cst_56 : f32 to vector<8x1xf32>
    %129 = arith.divf %127, %128 : vector<8x1xf32>
    %130 = vector.broadcast %122 : vector<8x1xf32> to vector<8x32xf32>
    %131 = arith.subf %114, %130 : vector<8x32xf32>
    %cst_57 = arith.constant 9.99999974E-6 : f32
    %132 = vector.broadcast %cst_57 : f32 to vector<8x1xf32>
    %133 = arith.addf %129, %132 : vector<8x1xf32>
    %134 = math.rsqrt %133 : vector<8x1xf32>
    %135 = vector.broadcast %134 : vector<8x1xf32> to vector<8x32xf32>
    %136 = arith.mulf %131, %135 : vector<8x32xf32>
    %137 = vector.broadcast %116 : vector<1x32xf32> to vector<8x32xf32>
    %138 = arith.mulf %136, %137 : vector<8x32xf32>
    %139 = vector.broadcast %118 : vector<1x32xf32> to vector<8x32xf32>
    %140 = arith.addf %138, %139 : vector<8x32xf32>
    %141 = arith.truncf %140 : vector<8x32xf32> to vector<8x32xbf16>
    %c0_58 = arith.constant 0 : index
    %c0_59 = arith.constant 0 : index
    %c0_60 = arith.constant 0 : index
    %142 = vector.load %arg11[%c0_58, %c0_59, %c0_60] : memref<1x32x128xf32, #tpu.memory_space<vmem>>, vector<1x32x128xf32>
    %143 = vector.shape_cast %142 : vector<1x32x128xf32> to vector<32x128xf32>
    %144 = arith.truncf %143 : vector<32x128xf32> to vector<32x128xbf16>
    %cst_61 = arith.constant dense<0.000000e+00> : vector<8x128xf32>
    %145 = tpu.matmul %141, %144, %cst_61 {dimension_numbers = #tpu.dot_dimension_numbers<[1], [0], [0], [1], [0, 0, 1, 1], [], []>} : vector<8x32xbf16>, vector<32x128xbf16>, vector<8x128xf32> -> vector<8x128xf32>
    %c0_62 = arith.constant 0 : index
    %c0_63 = arith.constant 0 : index
    %c0_64 = arith.constant 0 : index
    %146 = vector.load %arg12[%c0_62, %c0_63, %c0_64] : memref<1x1x128xf32, #tpu.memory_space<vmem>>, vector<1x1x128xf32>
    %147 = vector.shape_cast %146 : vector<1x1x128xf32> to vector<1x128xf32>
    %148 = vector.broadcast %147 : vector<1x128xf32> to vector<8x128xf32>
    %149 = arith.addf %145, %148 : vector<8x128xf32>
    %cst_65 = arith.constant 0.000000e+00 : f32
    %150 = vector.broadcast %cst_65 : f32 to vector<8x128xf32>
    %151 = arith.maximumf %149, %150 : vector<8x128xf32>
    %152 = arith.truncf %151 : vector<8x128xf32> to vector<8x128xbf16>
    %c0_66 = arith.constant 0 : index
    %c0_67 = arith.constant 0 : index
    %c0_68 = arith.constant 0 : index
    %153 = vector.load %arg13[%c0_66, %c0_67, %c0_68] : memref<1x128x32xf32, #tpu.memory_space<vmem>>, vector<1x128x32xf32>
    %154 = vector.shape_cast %153 : vector<1x128x32xf32> to vector<128x32xf32>
    %155 = arith.truncf %154 : vector<128x32xf32> to vector<128x32xbf16>
    %cst_69 = arith.constant dense<0.000000e+00> : vector<8x32xf32>
    %156 = tpu.matmul %152, %155, %cst_69 {dimension_numbers = #tpu.dot_dimension_numbers<[1], [0], [0], [1], [0, 0, 1, 1], [], []>} : vector<8x128xbf16>, vector<128x32xbf16>, vector<8x32xf32> -> vector<8x32xf32>
    %c0_70 = arith.constant 0 : index
    %c0_71 = arith.constant 0 : index
    %c0_72 = arith.constant 0 : index
    %157 = vector.load %arg14[%c0_70, %c0_71, %c0_72] : memref<1x1x32xf32, #tpu.memory_space<vmem>>, vector<1x1x32xf32>
    %158 = vector.shape_cast %157 : vector<1x1x32xf32> to vector<1x32xf32>
    %159 = vector.broadcast %158 : vector<1x32xf32> to vector<8x32xf32>
    %160 = arith.addf %156, %159 : vector<8x32xf32>
    %161 = arith.addf %114, %160 : vector<8x32xf32>
    %c0_73 = arith.constant 0 : index
    %c0_74 = arith.constant 0 : index
    %162 = vector.load %arg23[%c0_73, %c0_74] : memref<8x32xf32, #tpu.memory_space<vmem>>, vector<8x32xf32>
    tpu.vector_store %arg23[%c0_73, %c0_74], %161 {strides = array<i32>} : memref<8x32xf32, #tpu.memory_space<vmem>>, vector<8x32xf32>,
    %c1_i32 = arith.constant 1 : i32
    %163 = arith.cmpi eq, %arg1, %c1_i32 : i32
    %164 = arith.extui %163 : i1 to i32
    %c0_i32_75 = arith.constant 0 : i32
    %165 = arith.cmpi ne, %164, %c0_i32_75 : i32
    scf.if %165 {
      %166 = vector.shape_cast %161 : vector<8x32xf32> to vector<1x8x32xf32>
      %cst_76 = arith.constant dense<0.000000e+00> : vector<1x32xf32>
      %167 = vector.multi_reduction <add>, %166, %cst_76 [1] : vector<1x8x32xf32> to vector<1x32xf32>
      %cst_77 = arith.constant 8.000000e+00 : f32
      %168 = vector.broadcast %cst_77 : f32 to vector<1x32xf32>
      %169 = arith.divf %167, %168 : vector<1x32xf32>
      %170 = arith.truncf %169 : vector<1x32xf32> to vector<1x32xbf16>
      %c0_78 = arith.constant 0 : index
      %c0_79 = arith.constant 0 : index
      %171 = vector.load %arg15[%c0_78, %c0_79] : memref<32x32xf32, #tpu.memory_space<vmem>>, vector<32x32xf32>
      %172 = arith.truncf %171 : vector<32x32xf32> to vector<32x32xbf16>
      %cst_80 = arith.constant dense<0.000000e+00> : vector<1x32xf32>
      %173 = tpu.matmul %170, %172, %cst_80 {dimension_numbers = #tpu.dot_dimension_numbers<[1], [0], [0], [1], [0, 0, 1, 1], [], []>} : vector<1x32xbf16>, vector<32x32xbf16>, vector<1x32xf32> -> vector<1x32xf32>
      %c0_81 = arith.constant 0 : index
      %c0_82 = arith.constant 0 : index
      %174 = vector.load %arg16[%c0_81, %c0_82] : memref<1x32xf32, #tpu.memory_space<vmem>>, vector<1x32xf32>
      %175 = arith.addf %173, %174 : vector<1x32xf32>
      %c0_83 = arith.constant 0 : index
      %c0_84 = arith.constant 0 : index
      %176 = vector.load %arg17[%c0_83, %c0_84] : memref<1x32xf32, #tpu.memory_space<vmem>>, vector<1x32xf32>
      %177 = arith.mulf %175, %176 : vector<1x32xf32>
      %c0_85 = arith.constant 0 : index
      %c0_86 = arith.constant 0 : index
      %178 = vector.load %arg18[%c0_85, %c0_86] : memref<1x32xf32, #tpu.memory_space<vmem>>, vector<1x32xf32>
      %179 = arith.addf %177, %178 : vector<1x32xf32>
      %cst_87 = arith.constant 0.000000e+00 : f32
      %180 = vector.broadcast %cst_87 : f32 to vector<1x32xf32>
      %181 = arith.maximumf %179, %180 : vector<1x32xf32>
      %182 = arith.truncf %181 : vector<1x32xf32> to vector<1x32xbf16>
      %c0_88 = arith.constant 0 : index
      %c0_89 = arith.constant 0 : index
      %183 = vector.load %arg19[%c0_88, %c0_89] : memref<32x128xf32, #tpu.memory_space<vmem>>, vector<32x128xf32>
      %184 = arith.truncf %183 : vector<32x128xf32> to vector<32x128xbf16>
      %cst_90 = arith.constant dense<0.000000e+00> : vector<1x128xf32>
      %185 = tpu.matmul %182, %184, %cst_90 {dimension_numbers = #tpu.dot_dimension_numbers<[1], [0], [0], [1], [0, 0, 1, 1], [], []>} : vector<1x32xbf16>, vector<32x128xbf16>, vector<1x128xf32> -> vector<1x128xf32>
      %c0_91 = arith.constant 0 : index
      %c0_92 = arith.constant 0 : index
      %186 = vector.load %arg20[%c0_91, %c0_92] : memref<1x128xf32, #tpu.memory_space<vmem>>, vector<1x128xf32>
      %187 = arith.addf %185, %186 : vector<1x128xf32>
      %188 = vector.shape_cast %187 : vector<1x128xf32> to vector<1x1x128xf32>
      %c0_93 = arith.constant 0 : index
      %c0_94 = arith.constant 0 : index
      %c0_95 = arith.constant 0 : index
      %189 = vector.load %arg22[%c0_93, %c0_94, %c0_95] : memref<1x1x128xf32, #tpu.memory_space<vmem>>, vector<1x1x128xf32>
      tpu.vector_store %arg22[%c0_93, %c0_94, %c0_95], %188 {strides = array<i32>} : memref<1x1x128xf32, #tpu.memory_space<vmem>>, vector<1x1x128xf32>,
    } else {
    }
    return
  }
  func.func @transform_0(%arg0: i32, %arg1: i32) -> (i32, i32, i32) {
    %c0_i32 = arith.constant 0 : i32
    %c0_i32_0 = arith.constant 0 : i32
    %c0_i32_1 = arith.constant 0 : i32
    return %arg0, %c0_i32, %c0_i32_0 : i32, i32, i32
  }
  func.func @transform_1(%arg0: i32, %arg1: i32) -> (i32, i32, i32) {
    %c0_i32 = arith.constant 0 : i32
    %c0_i32_0 = arith.constant 0 : i32
    %c0_i32_1 = arith.constant 0 : i32
    return %arg1, %c0_i32, %c0_i32_0 : i32, i32, i32
  }
  func.func @transform_2(%arg0: i32, %arg1: i32) -> (i32, i32, i32) {
    %c0_i32 = arith.constant 0 : i32
    %c0_i32_0 = arith.constant 0 : i32
    %c0_i32_1 = arith.constant 0 : i32
    return %arg1, %c0_i32, %c0_i32_0 : i32, i32, i32
  }
  func.func @transform_3(%arg0: i32, %arg1: i32) -> (i32, i32, i32) {
    %c0_i32 = arith.constant 0 : i32
    %c0_i32_0 = arith.constant 0 : i32
    %c0_i32_1 = arith.constant 0 : i32
    return %arg1, %c0_i32, %c0_i32_0 : i32, i32, i32
  }
  func.func @transform_4(%arg0: i32, %arg1: i32) -> (i32, i32, i32) {
    %c0_i32 = arith.constant 0 : i32
    %c0_i32_0 = arith.constant 0 : i32
    %c0_i32_1 = arith.constant 0 : i32
    return %arg1, %c0_i32, %c0_i32_0 : i32, i32, i32
  }
  func.func @transform_5(%arg0: i32, %arg1: i32) -> (i32, i32, i32) {
    %c0_i32 = arith.constant 0 : i32
    %c0_i32_0 = arith.constant 0 : i32
    %c0_i32_1 = arith.constant 0 : i32
    return %arg1, %c0_i32, %c0_i32_0 : i32, i32, i32
  }
  func.func @transform_6(%arg0: i32, %arg1: i32) -> (i32, i32, i32) {
    %c0_i32 = arith.constant 0 : i32
    %c0_i32_0 = arith.constant 0 : i32
    %c0_i32_1 = arith.constant 0 : i32
    return %arg1, %c0_i32, %c0_i32_0 : i32, i32, i32
  }
  func.func @transform_7(%arg0: i32, %arg1: i32) -> (i32, i32, i32) {
    %c0_i32 = arith.constant 0 : i32
    %c0_i32_0 = arith.constant 0 : i32
    %c0_i32_1 = arith.constant 0 : i32
    return %arg1, %c0_i32, %c0_i32_0 : i32, i32, i32
  }
  func.func @transform_8(%arg0: i32, %arg1: i32) -> (i32, i32, i32) {
    %c0_i32 = arith.constant 0 : i32
    %c0_i32_0 = arith.constant 0 : i32
    %c0_i32_1 = arith.constant 0 : i32
    return %arg1, %c0_i32, %c0_i32_0 : i32, i32, i32
  }
  func.func @transform_9(%arg0: i32, %arg1: i32) -> (i32, i32, i32) {
    %c0_i32 = arith.constant 0 : i32
    %c0_i32_0 = arith.constant 0 : i32
    %c0_i32_1 = arith.constant 0 : i32
    return %arg1, %c0_i32, %c0_i32_0 : i32, i32, i32
  }
  func.func @transform_10(%arg0: i32, %arg1: i32) -> (i32, i32, i32) {
    %c0_i32 = arith.constant 0 : i32
    %c0_i32_0 = arith.constant 0 : i32
    %c0_i32_1 = arith.constant 0 : i32
    return %arg1, %c0_i32, %c0_i32_0 : i32, i32, i32
  }
  func.func @transform_11(%arg0: i32, %arg1: i32) -> (i32, i32, i32) {
    %c0_i32 = arith.constant 0 : i32
    %c0_i32_0 = arith.constant 0 : i32
    %c0_i32_1 = arith.constant 0 : i32
    return %arg1, %c0_i32, %c0_i32_0 : i32, i32, i32
  }
  func.func @transform_12(%arg0: i32, %arg1: i32) -> (i32, i32, i32) {
    %c0_i32 = arith.constant 0 : i32
    %c0_i32_0 = arith.constant 0 : i32
    %c0_i32_1 = arith.constant 0 : i32
    return %arg1, %c0_i32, %c0_i32_0 : i32, i32, i32
  }
  func.func @transform_13(%arg0: i32, %arg1: i32) -> (i32, i32) {
    %c0_i32 = arith.constant 0 : i32
    %c0_i32_0 = arith.constant 0 : i32
    %c0_i32_1 = arith.constant 0 : i32
    return %c0_i32, %c0_i32_0 : i32, i32
  }
  func.func @transform_14(%arg0: i32, %arg1: i32) -> (i32, i32) {
    %c0_i32 = arith.constant 0 : i32
    %c0_i32_0 = arith.constant 0 : i32
    %c0_i32_1 = arith.constant 0 : i32
    return %c0_i32, %c0_i32_0 : i32, i32
  }
  func.func @transform_15(%arg0: i32, %arg1: i32) -> (i32, i32) {
    %c0_i32 = arith.constant 0 : i32
    %c0_i32_0 = arith.constant 0 : i32
    %c0_i32_1 = arith.constant 0 : i32
    return %c0_i32, %c0_i32_0 : i32, i32
  }
  func.func @transform_16(%arg0: i32, %arg1: i32) -> (i32, i32) {
    %c0_i32 = arith.constant 0 : i32
    %c0_i32_0 = arith.constant 0 : i32
    %c0_i32_1 = arith.constant 0 : i32
    return %c0_i32, %c0_i32_0 : i32, i32
  }
  func.func @transform_17(%arg0: i32, %arg1: i32) -> (i32, i32) {
    %c0_i32 = arith.constant 0 : i32
    %c0_i32_0 = arith.constant 0 : i32
    %c0_i32_1 = arith.constant 0 : i32
    return %c0_i32, %c0_i32_0 : i32, i32
  }
  func.func @transform_18(%arg0: i32, %arg1: i32) -> (i32, i32) {
    %c0_i32 = arith.constant 0 : i32
    %c0_i32_0 = arith.constant 0 : i32
    %c0_i32_1 = arith.constant 0 : i32
    return %c0_i32, %c0_i32_0 : i32, i32
  }
  func.func @transform_19(%arg0: i32, %arg1: i32) -> (i32, i32, i32, i32, i32) {
    %c0_i32 = arith.constant 0 : i32
    %c0_i32_0 = arith.constant 0 : i32
    %c0_i32_1 = arith.constant 0 : i32
    %c0_i32_2 = arith.constant 0 : i32
    return %arg1, %arg0, %c0_i32, %c0_i32_0, %c0_i32_1 : i32, i32, i32, i32, i32
  }
  func.func @transform_20(%arg0: i32, %arg1: i32) -> (i32, i32, i32) {
    %c0_i32 = arith.constant 0 : i32
    %c0_i32_0 = arith.constant 0 : i32
    %c0_i32_1 = arith.constant 0 : i32
    return %arg0, %c0_i32, %c0_i32_0 : i32, i32, i32
  }
}

</mosaic_0001>

<bundles_post_ra>
// kernel: tpu_custom_call.1
= control target key start
LH: loop header
LB: loop body
LE: loop exit
PB: predicated region body
PF: predicated region fallthrough
CT: control target
= control target key end

     0   :  { %s2373_s0 = inlined_call_operand.vmem [shape: f32[2,8,32], index: 0, kind: input, shape index: {}]   ;;  %s2374_s1 = inlined_call_operand.vmem [shape: f32[2,1,32], index: 1, kind: input, shape index: {}]   ;;  %s2375_s2 = inlined_call_operand.vmem [shape: f32[2,1,32], index: 2, kind: input, shape index: {}]   ;;  %s2376_s3 = inlined_call_operand.vmem [shape: f32[2,32,96], index: 3, kind: input, shape index: {}]   ;;  %s2377_s4 = inlined_call_operand.vmem [shape: f32[2,1,96], index: 4, kind: input, shape index: {}]   ;;  %s2378_s5 = inlined_call_operand.vmem [shape: f32[2,32,32], index: 5, kind: input, shape index: {}]   ;;  %s2379_s6 = inlined_call_operand.vmem [shape: f32[2,1,32], index: 6, kind: input, shape index: {}]   ;;  %s2380_s7 = inlined_call_operand.vmem [shape: f32[2,1,32], index: 7, kind: input, shape index: {}]   ;;  %s2381_s8 = inlined_call_operand.vmem [shape: f32[2,1,32], index: 8, kind: input, shape index: {}]   ;;  %s2382_s9 = inlined_call_operand.vmem [shape: f32[2,32,128], index: 9, kind: input, shape index: {}]   ;;  %s2383_s10 = inlined_call_operand.vmem [shape: f32[2,1,128], index: 10, kind: input, shape index: {}]   ;;  %s2384_s11 = inlined_call_operand.vmem [shape: f32[2,128,32], index: 11, kind: input, shape index: {}]   ;;  %s2385_s12 = inlined_call_operand.vmem [shape: f32[2,1,32], index: 12, kind: input, shape index: {}]   ;;  %s2386_s13 = inlined_call_operand.vmem [shape: f32[32,32], index: 13, kind: input, shape index: {}]   ;;  %s2387_s14 = inlined_call_operand.vmem [shape: f32[1,32], index: 14, kind: input, shape index: {}]   ;;  %s2388_s15 = inlined_call_operand.vmem [shape: f32[1,32], index: 15, kind: input, shape index: {}]   ;;  %s2389_s16 = inlined_call_operand.vmem [shape: f32[1,32], index: 16, kind: input, shape index: {}]   ;;  %s2390_s17 = inlined_call_operand.vmem [shape: f32[32,128], index: 17, kind: input, shape index: {}]   ;;  %s2391_s18 = inlined_call_operand.vmem [shape: f32[1,128], index: 18, kind: input, shape index: {}]   ;;  %s2392_s19 = inlined_call_operand.hbm [shape: f32[2,2,2,8,8], index: 19, kind: output, shape index: {0}]   ;;  %s2393_s20 = inlined_call_operand.hbm [shape: f32[2,1,128], index: 20, kind: output, shape index: {1}]  }
   0x1   :  { %2419 = sst [smem:[#allocation27_spill]] %s2373_s0 }
   0x2   :  { %2420 = sst [smem:[#allocation28_spill]] %s2374_s1 }
   0x3   :  { %2421 = sst [smem:[#allocation29_spill]] %s2375_s2 }
   0x4   :  { %2422 = sst [smem:[#allocation30_spill]] %s2376_s3 }
   0x5   :  { %2423 = sst [smem:[#allocation31_spill]] %s2377_s4 }
   0x6   :  { %2424 = sst [smem:[#allocation32_spill]] %s2378_s5 }
   0x7   :  { %2425 = sst [smem:[#allocation33_spill]] %s2379_s6 }
   0x8   :  { %2426 = sst [smem:[#allocation34_spill]] %s2380_s7 }
   0x9   :  { %2427 = sst [smem:[#allocation35_spill]] %s2384_s11 }
   0xa   :  { %2428 = sst [smem:[#allocation36_spill]] %s2386_s13 }
   0xb   :  { %2429 = sst [smem:[#allocation37_spill]] %s2387_s14 }
   0xc   :  { %2430 = sst [smem:[#allocation38_spill]] %s2388_s15 }
   0xd   :  { %2431 = sst [smem:[#allocation39_spill]] %s2389_s16 }
   0xe   :  { %2432 = sst [smem:[#allocation40_spill]] %s2390_s17 }
   0xf   :  { %2433 = sst [smem:[#allocation41_spill]] %s2391_s18 }
  0x10   :  { %2434 = sst [smem:[#allocation42_spill]] %s2392_s19 }
  0x11   :  { %2435 = sst [smem:[#allocation43_spill]] %s2393_s20 }
  0x12   :  { %26 = vsyncpa [#allocation4], 0 }
  0x13   :  { %28 = vsyncpa [#allocation4 + $0x1], 0 }
  0x14   :  { %29 = vsyncpa [#allocation6], 0 }
  0x15   :  { %31 = vsyncpa [#allocation6 + $0x1], 0  ;;  %s1958_s1 = smov 0   ;;  %s1960_s22 = smov 0  }
  0x16   :  { %s1962_s23 = smov 0   ;;  %s1964_s24 = smov 0  }
  0x17   :  { %s1966_s2 = smov 0   ;;  %s1968_s25 = smov 0  }
  0x18   :  { %s1970_s3 = smov 0   ;;  %s1972_s26 = smov 0  }
  0x19   :  { %s1974_s27 = smov 0   ;;  %s1976_s28 = smov 0  }
  0x1a   :  { %s1978_s4 = smov 0  }
  0x1b LB: > { %2436 = sst [smem:[#allocation9_spill]] %s1802_s1  ;;  %s1521_s29 = sadd.s32 4294967295, %s1842_s4   ;;  %s1842_s4 = sphi %s1978_s4, %s37_s4   ;;  %s1838_s28 = sphi %s1976_s28, %s2512_s28   ;;  %s1834_s27 = sphi %s1974_s27, %s2516_s27   ;;  %s1830_s26 = sphi %s1972_s26, %s2510_s26   ;;  %s1826_s3 = sphi %s1970_s3, %s2509_s3   ;;  %s1822_s25 = sphi %s1968_s25, %s2515_s25   ;;  %s1818_s2 = sphi %s1966_s2, %s2507_s2   ;;  %s1814_s24 = sphi %s1964_s24, %s2506_s24   ;;  %s1810_s23 = sphi %s1962_s23, %s2505_s23   ;;  %s1806_s22 = sphi %s1960_s22, %s2514_s22   ;;  %s1802_s1 = sphi %s1958_s1, %s2513_s1  }
  0x1c   : > { %2437 = sst [smem:[#allocation10_spill]] %s1810_s23  ;;  %s1522_s30 = sadd.s32 4294967294, %s1842_s4  }
  0x1d   : > { %2438 = sst [smem:[#allocation11_spill]] %s1814_s24  ;;  %s46_s0 = sadd.s32 1, %s1834_s27 }
  0x1e   : > { %2439 = sst [smem:[#allocation12_spill]] %s1818_s2  ;;  %s49_s21 = sadd.s32 1, %s1838_s28 }
  0x1f   : > { %2440 = sst [smem:[#allocation13_spill]] %s1822_s25  ;;  %p47_p0 = scmp.ge.s32.totalorder %s46_s0, 2 }
  0x20   : > { %2441 = sst [smem:[#allocation14_spill]] %s1826_s3  ;;  %s522_s20 = sadd.s32 1, %s1822_s25 }
  0x21   : > { %2442 = sst [smem:[#allocation15_spill]] %s1830_s26  ;;  %p532_p1 = scmp.ne.s32.totalorder %s1822_s25, %s1818_s2 }
  0x22   : > { %2443 = sst [smem:[#allocation16_spill]] %s1834_s27  ;;  %p2020_p2 = scmp.eq.s32.totalorder %s1521_s29, 3 }
  0x23   : > { %2444 = sst [smem:[#allocation17_spill]] %s1838_s28  ;;  %s2518_s0 = smov (%p47_p0, %s46_s0), 0 }
  0x24   : > { %2445 = sst [smem:[#allocation18_spill]] %s1842_s4  ;;  %s2520_s21 = smov (!%p47_p0, %s49_s21), %s1838_s28 }
  0x25   : > { %2447 = sst [smem:[#allocation19_spill]] %s2518_s0  ;;  %s517_s18 = ssub.s32 %s1834_s27, %s2518_s0 }
  0x26   : > { %p2031_p3 = por %p2020_p2, %p532_p1  ;;  %p51_p4 = scmp.ge.s32.totalorder %s2520_s21, 2 }
  0x27   : > { %p538_p5 = scmp.ne.s32.totalorder %s1818_s2, %s1814_s24  ;;  %p2037_p6 = scmp.eq.s32.totalorder %s1522_s30, 3 }
  0x28   : > { %s2448_s16 = scalar_select %p2031_p3, 1, 0 }
  0x29   : > { %s548_s15 = sadd.s32 1, %s1810_s23  ;;  %s2522_s21 = smov (%p51_p4, %s2520_s21), 0 }
  0x2a   : > { %2449 = sst [smem:[#allocation20_spill]] %s2448_s16  ;;  %p2046_p7 = por %p2037_p6, %p538_p5 }
  0x2b   : > { %2451 = sst [smem:[#allocation21_spill]] %s2522_s21  ;;  %p558_p8 = scmp.ne.s32.totalorder %s1810_s23, %s1806_s22 }
  0x2c   : > { %s2452_s0 = scalar_select %p2046_p7, 1, 0 }
  0x2d   : > { %s518_s27 = ssub.s32 %s1838_s28, %s2522_s21  ;;  %p564_p9 = scmp.ne.s32.totalorder %s1806_s22, %s1802_s1 }
  0x2e   : > { %2453 = sst [smem:[#allocation22_spill]] %s2452_s0  ;;  %s519_s24 = sor.u32 %s518_s27, %s517_s18 }
  0x2f   : > { %p546_p10 = scmp.eq.s32.totalorder %s518_s27, 0  ;;  %p520_p11 = scmp.eq.s32.totalorder %s519_s24, 0 }
  0x30   : > { %p2058_p12 = por %p558_p8, %p2020_p2  ;;  %p2070_p13 = por %p564_p9, %p2037_p6 }
  0x31   : > { %s2063_s16 = scalar_select %p546_p10, %s1810_s23, %s548_s15  }
  0x32   : > { %s2454_s30 = scalar_select %p2058_p12, 1, 0 }
  0x33   : > { %2456 = sst [smem:[#allocation24_spill]] %s2063_s16  ;;  %p1525_p0 = scmp.ge.s32.totalorder %s1842_s4, 1 }
  0x34   : > { %2455 = sst [smem:[#allocation23_spill]] %s2454_s30  ;;  %p688_p1 = scmp.lt.s32.totalorder %s1842_s4, 5 }
  0x35   : > { %s2066_s14 = scalar_select %p520_p11, %s1822_s25, %s522_s20  }
  0x36   : > { %s2458_s17 = scalar_select %p2070_p13, 1, 0 }
  0x37   : > { %2457 = sst [smem:[#allocation25_spill]] %s2066_s14  ;;  %p689_p4 = pnand %p1525_p0, %p688_p1 }
  0x38   : > { %2459 = sst [smem:[#allocation26_spill]] %s2458_s17  ;;  %s2403_s15 = sand.u32 (!%p689_p4), 1, %s1818_s2  }
  0x39   : > { %692 = sbr.rel (%p689_p4) target bundleno = 2153 (0x869), region = 96  ;;  %s1526_s19 = sshll.u32 (!%p689_p4), %s2403_s15, 4 }
  0x3a   : > { %p793_p2 = scmp.lt.s32.totalorder (!%p689_p4), %s1830_s26, 1  ;;  %p797_p5 = scmp.lt.s32.totalorder (!%p689_p4), %s1826_s3, 1 }
  0x3b   : > { %s2460_s21 = sld [smem:[#allocation27_spill]] (!%p689_p4)  ;;  %s2143_s2 = scalar_lea.vmem (!%p689_p4), [#allocation3], %s1526_s19 }
  0x3c   : > { %s2465_s5 = sld [smem:[#allocation32_spill]] (!%p689_p4) }
  0x3d   : > { %s2468_s29 = sld [smem:[#allocation35_spill]] (!%p689_p4) }
  0x3e   : > { %s794_s20 = scalar_select %p793_p2, %s1830_s26, 1 }
  0x3f   : > { %s2084_s24 = scalar_select %p797_p5, %s1826_s3, 1 }
  0x40   : > { %s1527_s27 = sshll.u32 %s794_s20, 3  ;;  %s2463_s26 = sld [smem:[#allocation30_spill]] }
  0x41   : > { %s796_s15 = scalar_lea.vmem %s2460_s21, %s1527_s27  ;;  %s1555_s4 = sshll.u32 %s2084_s24, 5 }
  0x42   : > { %s2110_s14 = scalar_lea.vmem %s2465_s5, %s1555_s4  ;;  %s824_s30 = scalar_lea.vmem %s2381_s8, %s2084_s24 }
  0x43   : > { %s2127_s11 = scalar_lea.vmem %s2382_s9, %s1555_s4  ;;  %s832_s27 = scalar_lea.vmem %s2383_s10, %s2084_s24 }
  0x44   : > { %s1558_s18 = sshll.u32 %s2084_s24, 7  ;;  %s840_s17 = scalar_lea.vmem %s2385_s12, %s2084_s24 }
  0x45   : > { %s2141_s16 = scalar_lea.vmem %s2468_s29, %s1558_s18 }
  0x46   : > { %s2101_s13 = scalar_lea.vmem %s2463_s26, %s1555_s4  ;;  %s2469_s26 = sand.u32 1, %s1806_s22  }
  0x47   : > { %s2147_s0 = scalar_lea.vmem [#allocation5], %s2469_s26  ;;  %s2470_s4 = sld [smem:[#allocation14_spill]] }
  0x4d   : > { %p1536_p6 = scmp.ne.s32.totalorder %s2470_s4, 0 }
  0x4f   : > { %845 = sbr.rel (%p1536_p6) target bundleno = 86 (0x56), region = 100 }
  0x54   : > { %v846_v0 = vld [vmem:[%s796_s15] sm:$0xff]  ;;  %vm847_vm0 = vcmask 261120  }
  0x55   : > { %848 = vst.msk [vmem:[#allocation2] sm:$0xff] %vm847_vm0, %v846_v0 }
  0x56 PF: > { %vm852_vm1 = vcmask 261120   ;;  %v1844_v3 = vmov 32.0   ;;  %v893_v15 = vld [vmem:[%s2101_s13 + $0x10] sm:$0xff]  ;;  %v894_v16 = vld [vmem:[%s2101_s13 + $0x18] sm:$0xff]  ;;  %v891_v18 = vld [vmem:[%s2101_s13] sm:$0xff]  ;;  %s2471_s19 = sld [smem:[#allocation28_spill]] }
  0x57   : > { %1676 = vrcp.f32 %v1844_v3  ;;  %v896_v17 = vpack.c.bf16 %v894_v16, %v893_v15  ;;  %v892_v19 = vld [vmem:[%s2101_s13 + $0x8] sm:$0xff]  ;;  %s2473_s20 = sld [smem:[#allocation29_spill]]  ;;  %s1845_s26 = smov 96   ;;  %vm927_vm6 = vcmask 130048   ;;  %vm948_vm7 = vcmask 64512  }
  0x58   : > { %v895_v20 = vpack.c.bf16 %v892_v19, %v891_v18  ;;  %s2475_s1 = sld [smem:[#allocation31_spill]]  ;;  %s1846_s4 = smov 80   ;;  %vm967_vm8 = vcmask 1043456   ;;  %v918_v18 = vld [vmem:[%s2110_s14 + $0x8] sm:$0xff] }
  0x59   : > { %910 = vmatpush.bf16.msra.mxu0 %v896_v17  ;;  %s1847_s13 = smov 112   ;;  %s1848_s15 = smov 64   ;;  %v917_v17 = vld [vmem:[%s2110_s14] sm:$0xff] }
  0x5a   : > { %v985_v19 = vpack.c.bf16 %v918_v18, %v917_v17  ;;  %s2477_s6 = sld [smem:[#allocation33_spill]] }
  0x5b   : > { %s2479_s7 = sld [smem:[#allocation34_spill]] }
  0x5c   : > { %v2150_v1 = vld [vmem:[#allocation2] sm:$0xff]  ;;  %s2472_s18 = scalar_lea.vmem %s2471_s19, %s2084_s24  ;;  %s1849_s19 = smov 48  }
  0x5d   : > { %v853_v2 = vsel %vm852_vm1, %v2150_v1, 0.0  ;;  %v1677_v4 = vpop.eup %1676  ;;  %911 = vmatpush.bf16.msra.mxu0 %v895_v20  ;;  %v1668_v30 = vld [vmem:[%s2472_s18] ss:$0 sm:$0xff]  ;;  %s2474_s21 = scalar_lea.vmem %s2473_s20, %s2084_s24  ;;  %v919_v20 = vld [vmem:[%s2110_s14 + $0x10] sm:$0xff] }
  0x5e   : > { %854 = vadd.xlane.f32.xlu0 %v853_v2  ;;  %v857_v5 = vmul.f32 32.0, %v1677_v4  ;;  %vm861_vm2 = vweird.f32 %v1677_v4  ;;  %v1669_v33 = vld [vmem:[%s2474_s21] ss:$0 sm:$0xff]  ;;  %s2476_s23 = scalar_lea.vmem %s2475_s1, %s2084_s24 }
  0x5f   : > { %v1670_v37 = vld [vmem:[%s2476_s23] ss:$0 sm:$0xff] }
  0x60   : > { %v858_v6 = vsub.f32 1.0, %v857_v5  ;;  %s2478_s29 = scalar_lea.vmem %s2477_s6, %s2084_s24 }
  0x61   : > { %s2480_s20 = scalar_lea.vmem %s2479_s7, %s2084_s24 }
  0x62   : > { %v859_v7 = vmul.f32 %v1677_v4, %v858_v6 }
  0x64   : > { %v860_v8 = vadd.f32 %v1677_v4, %v859_v7 }
  0x66   : > { %v2154_v9 = vsel %vm861_vm2, %v1677_v4, %v860_v8 }
  0xd1   : > { %v855_v10 = vpop.xlane.xlu0 %854 }
  0xd2   : > { %v863_v11 = vmul.f32 %v2154_v9, %v855_v10 }
  0xd4   : > { %v864_v12 = vsub.f32 %v2150_v1, %v863_v11 }
  0xd6   : > { %v865_v13 = vmul.f32 %v864_v12, %v864_v12 }
  0xd8   : > { %v866_v14 = vsel %vm852_vm1, %v865_v13, 0.0 }
  0xd9   : > { %867 = vadd.xlane.f32.xlu0 %v866_v14 }
 0x14c   : > { %v868_v21 = vpop.xlane.xlu0 %867 }
 0x14d   : > { %v869_v22 = vmul.f32 %v868_v21, %v2154_v9  ;;  %v920_v21 = vld [vmem:[%s2110_s14 + $0x18] sm:$0xff] }
 0x14f   : > { %v870_v23 = vadd.f32 1e-05, %v869_v22  ;;  %v1046_v22 = vpack.c.bf16 %v920_v21, %v919_v20  ;;  %v1149_v20 = vld [vmem:[%s2141_s16 + $0x18] sm:$0xff] }
 0x151   : > { %1678 = vrsqrt.f32 %v870_v23  ;;  %vm877_vm4 = vweird.f32 %v870_v23 }
 0x157   : > { %v1679_v24 = vpop.eup %1678 }
 0x158   : > { %v872_v25 = vmul.f32 %v1679_v24, %v870_v23  ;;  %vm878_vm3 = vweird.f32 %v1679_v24 }
 0x159   : > { %vm879_vm5 = vmor %vm877_vm4, %vm878_vm3 }
 0x15a   : > { %v873_v26 = vmul.f32 %v1679_v24, %v872_v25 }
 0x15c   : > { %v874_v27 = vmul.f32 0.5, %v873_v26 }
 0x15e   : > { %v875_v28 = vsub.f32 1.5, %v874_v27 }
 0x160   : > { %v876_v29 = vmul.f32 %v1679_v24, %v875_v28 }
 0x162   : > { %v880_v31 = vsel %vm879_vm5, %v1679_v24, %v876_v29 }
 0x163   : > { %v881_v32 = vmul.f32 %v880_v31, %v864_v12 }
 0x165   : > { %v885_v34 = vmul.f32 %v1668_v30, %v881_v32 }
 0x167   : > { %v889_v35 = vadd.f32 %v1669_v33, %v885_v34  ;;  %v1671_v33 = vld [vmem:[%s2478_s29] ss:$0 sm:$0xff] }
 0x169   : > { %v890_v36 = vpack.c.bf16 %v889_v35, %v889_v35 }
 0x16b   : > { %1537 = vmatmul.msk.bf16.vlgmr.msra.gmra.mxu0 %vm852_vm1, %v890_v36 }
 0x1e8   : > { %v913_v38 = vpop.f32.mrf.mxu0 }
 0x1e9   : > { %v914_v39 = vadd.f32 %v1670_v37, %v913_v38 }
 0x1eb   : > { %v921_v40 = vpack.c.bf16 %v914_v39, %v914_v39 }
 0x1ed   : > { %v923_v41 = vunpack.c.l.b16 %v921_v40 }
 0x1ef   : > { %v924_v42 = vpack.c.b16 %v923_v41, %v923_v41 }
 0x1f0   : > { %v915_v43 = vpop.f32.mrf.mxu0 }
 0x1f1   : > { %925 = vrot.lane.b32.xlu2 %v924_v42, %s1845_s26  ;;  %988 = vrot.lane.b32.xlu1 %v924_v42, %s1846_s4  ;;  %v1121_v43 = vld [vmem:[%s2127_s11 + $0x18] sm:$0xff] }
 0x1f9   : > { %986 = vrot.lane.b32.xlu1 %v924_v42, %s1847_s13 }
 0x24b   : > { %v926_v44 = vpop.permute.xlu2 %925 }
 0x24c   : > { %v932_v45 = vsel %vm927_vm6, %v926_v44, 0 }
 0x24d   : > { %941 = vmatpush.bf16.xpose.msra.mxu1 %v932_v45  ;;  %v1118_v45 = vld [vmem:[%s2127_s11] sm:$0xff] }
 0x254   : > { %1538 = vmatmul.msk.bf16.vlgmr.msra.gmra.mxu1 %vm927_vm6, %v921_v40 }
 0x255   : > { %1073 = vmatpush.bf16.msrb.mxu1 %v985_v19  ;;  %v1148_v19 = vld [vmem:[%s2141_s16 + $0x10] sm:$0xff] }
 0x256   : > { %v1163_v21 = vpack.c.bf16 %v1149_v20, %v1148_v19 }
 0x263   : > { %v989_v46 = vpop.permute.xlu1 %988 }
 0x264   : > { %v994_v47 = vsel %vm927_vm6, %v989_v46, 0  ;;  %v1119_v46 = vld [vmem:[%s2127_s11 + $0x8] sm:$0xff] }
 0x265   : > { %1003 = vmatpush.bf16.xpose.msra.mxu3 %v994_v47  ;;  %v1122_v47 = vpack.c.bf16 %v1119_v46, %v1118_v45 }
 0x26b   : > { %v987_v48 = vpop.permute.xlu1 %986 }
 0x26c   : > { %1540 = vmatmul.msk.bf16.vlgmr.msra.gmra.mxu3 %vm927_vm6, %v987_v48  ;;  %v1160_v48 = vld [vmem:[%s2141_s16 + $0x70] sm:$0xff] }
 0x2d1   : > { %v943_v49 = vpop.f32.mrf.mxu1 }
 0x2d2   : > { %v947_v50 = vmul.f32 0.25, %v943_v49  ;;  %v1161_v49 = vld [vmem:[%s2141_s16 + $0x78] sm:$0xff] }
 0x2d4   : > { %v949_v51 = vsel %vm948_vm7, %v947_v50, -inf }
 0x2d5   : > { %950 = vmax.xlane.f32.xlu0 %v949_v51 }
 0x2d9   : > { %v945_v52 = vpop.f32.mrf.mxu1 }
 0x2da   : > { %v1169_v52 = vpack.c.bf16 %v1161_v49, %v1160_v48 }
 0x2ef   : > { %v1005_v53 = vpop.f32.mrf.mxu3 }
 0x2f0   : > { %v1009_v54 = vmul.f32 0.25, %v1005_v53  ;;  %v1159_v53 = vld [vmem:[%s2141_s16 + $0x68] sm:$0xff] }
 0x2f2   : > { %v1010_v55 = vsel %vm948_vm7, %v1009_v54, -inf }
 0x2f3   : > { %1011 = vmax.xlane.f32.xlu2 %v1010_v55 }
 0x2f7   : > { %v1007_v56 = vpop.f32.mrf.mxu3 }
 0x30b   : > { %962 = vrot.lane.b32.xlu2 %v924_v42, %s1848_s15 }
 0x348   : > { %v951_v57 = vpop.xlane.xlu0 %950 }
 0x349   : > { %v952_v58 = vsub.f32 %v947_v50, %v951_v57  ;;  %v1158_v50 = vld [vmem:[%s2141_s16 + $0x60] sm:$0xff]  ;;  %v1156_v57 = vld [vmem:[%s2141_s16 + $0x50] sm:$0xff] }
 0x34a   : > { %v1168_v55 = vpack.c.bf16 %v1159_v53, %v1158_v50 }
 0x34b   : > { %v953_v59 = vmul.f32 1.442695, %v952_v58  ;;  %v1157_v58 = vld [vmem:[%s2141_s16 + $0x58] sm:$0xff] }
 0x34d   : > { %1680 = vpow2.f32 %v953_v59  ;;  %v1167_v59 = vpack.c.bf16 %v1157_v58, %v1156_v57 }
 0x353   : > { %v1681_v60 = vpop.eup %1680 }
 0x354   : > { %v955_v61 = vsel %vm948_vm7, %v1681_v60, 0.0 }
 0x355   : > { %956 = vadd.xlane.f32.xlu0 %v955_v61  ;;  %v1155_v61 = vld [vmem:[%s2141_s16 + $0x48] sm:$0xff] }
 0x366   : > { %v1012_v62 = vpop.xlane.xlu2 %1011 }
 0x367   : > { %v1013_v63 = vsub.f32 %v1009_v54, %v1012_v62 }
 0x369   : > { %v1014_v0 = vmul.f32 1.442695, %v1013_v63  ;;  %1024 = vrot.lane.b32.xlu0 %v924_v42, %s1849_s19 }
 0x36b   : > { %1682 = vpow2.f32 %v1014_v0  ;;  %v1152_v0 = vld [vmem:[%s2141_s16 + $0x30] sm:$0xff] }
 0x36e   : > { %v963_v2 = vpop.permute.xlu2 %962 }
 0x36f   : > { %v969_v3 = vsel %vm967_vm8, %v963_v2, 0  ;;  %v1153_v2 = vld [vmem:[%s2141_s16 + $0x38] sm:$0xff] }
 0x370   : > { %978 = vmatpush.bf16.msrb.mxu0 %v969_v3 }
 0x371   : > { %v1683_v4 = vpop.eup %1682 }
 0x372   : > { %v1016_v5 = vsel %vm948_vm7, %v1683_v4, 0.0 }
 0x373   : > { %1017 = vadd.xlane.f32.xlu1 %v1016_v5  ;;  %v1150_v5 = vld [vmem:[%s2141_s16 + $0x20] sm:$0xff] }
 0x374   : > { %1057 = vmatpush.bf16.msra.mxu0 %v1046_v22  ;;  %v1146_v22 = vld [vmem:[%s2141_s16] sm:$0xff] }
 0x3c8   : > { %v957_v6 = vpop.xlane.xlu0 %956 }
 0x3c9   : > { %1684 = vrcp.f32 %v957_v6  ;;  %v1151_v6 = vld [vmem:[%s2141_s16 + $0x28] sm:$0xff] }
 0x3cf   : > { %v1685_v7 = vpop.eup %1684 }
 0x3d0   : > { %v959_v8 = vmul.f32 %v1685_v7, %v1681_v60  ;;  %v1154_v60 = vld [vmem:[%s2141_s16 + $0x40] sm:$0xff] }
 0x3d1   : > { %v1166_v62 = vpack.c.bf16 %v1155_v61, %v1154_v60 }
 0x3d2   : > { %960 = vst.msk [vmem:[%s2143_s2] sm:$0xff] %vm948_vm7, %v959_v8  ;;  %v961_v10 = vpack.c.bf16 %v959_v8, %v959_v8 }
 0x3d4   : > { %1539 = vmatmul.msk.bf16.vlgmr.msrb.gmra.mxu0 %vm948_vm7, %v961_v10  ;;  %v1164_v10 = vpack.c.bf16 %v1151_v6, %v1150_v5 }
 0x3db   : > { %v1025_v11 = vpop.permute.xlu0 %1024 }
 0x3dc   : > { %v1030_v12 = vsel %vm967_vm8, %v1025_v11, 0 }
 0x3dd   : > { %1039 = vmatpush.bf16.msra.mxu2 %v1030_v12  ;;  %v1672_v12 = vld [vmem:[%s2480_s20] ss:$0 sm:$0xff] }
 0x3e1   : > { %1174 = vmatpush.bf16.msrb.mxu2 %v1169_v52 }
 0x3e5   : > { %1175 = vmatpush.bf16.msrb.mxu2 %v1168_v55 }
 0x3e6   : > { %v1018_v13 = vpop.xlane.xlu1 %1017 }
 0x3e7   : > { %1686 = vrcp.f32 %v1018_v13 }
 0x3e9   : > { %1176 = vmatpush.bf16.msrb.mxu2 %v1167_v59 }
 0x3ed   : > { %v1687_v14 = vpop.eup %1686  ;;  %1177 = vmatpush.bf16.msrb.mxu2 %v1166_v62 }
 0x3ee   : > { %v1020_v15 = vmul.f32 %v1687_v14, %v1683_v4  ;;  %v1165_v4 = vpack.c.bf16 %v1153_v2, %v1152_v0 }
 0x3f0   : > { %1541 = vst.msk [vmem:[%s2143_s2 + $0x8] sm:$0xff] %vm948_vm7, %v1020_v15  ;;  %v1023_v16 = vpack.c.bf16 %v1020_v15, %v1020_v15  ;;  %v1673_v15 = vld [vmem:[%s824_s30] ss:$0 sm:$0xff] }
 0x3f1   : > { %1178 = vmatpush.bf16.msrb.mxu2 %v1165_v4 }
 0x3f2   : > { %1542 = vmatmul.msk.bf16.vlgmr.msra.gmra.mxu2 %vm948_vm7, %v1023_v16 }
 0x3f5   : > { %1179 = vmatpush.bf16.msrb.mxu2 %v1164_v10 }
 0x3f9   : > { %1180 = vmatpush.bf16.msrb.mxu2 %v1163_v21 }
 0x451   : > { %v980_v23 = vpop.f32.mrf.mxu0 }
 0x452   : > { %v984_v24 = vpack.c.bf16 %v980_v23, %v980_v23  ;;  %v1147_v23 = vld [vmem:[%s2141_s16 + $0x8] sm:$0xff]  ;;  %s2481_s16 = sld [smem:[#allocation14_spill]] }
 0x454   : > { %1544 = vmatmul.msk.bf16.vlgmr.msrb.gmra.mxu1 %vm927_vm6, %v984_v24  ;;  %v1162_v24 = vpack.c.bf16 %v1147_v23, %v1146_v22 }
 0x456   : > { %1181 = vmatpush.bf16.msrb.mxu2 %v1162_v24 }
 0x458   : > { %p1546_p8 = scmp.ne.s32.totalorder %s2481_s16, 1 }
 0x459   : > { %v982_v25 = vpop.f32.mrf.mxu0  ;;  %s2482_s4 = sld [smem:[#allocation36_spill]] (!%p1546_p8) }
 0x45a   : > { %v1674_v25 = vld [vmem:[%s832_s27] ss:$0 sm:$0xff]  ;;  %s2484_s3 = sld [smem:[#allocation40_spill]] (!%p1546_p8) }
 0x45b   : > { %s2486_s26 = sld [smem:[#allocation37_spill]] (!%p1546_p8) }
 0x45c   : > { %s2487_s19 = sld [smem:[#allocation38_spill]] (!%p1546_p8) }
 0x45d   : > { %s2488_s18 = sld [smem:[#allocation39_spill]] (!%p1546_p8) }
 0x45f   : > { %s2483_s13 = smov (!%p1546_p8), %s2482_s4 }
 0x460   : > { %s2485_s20 = smov (!%p1546_p8), %s2484_s3 }
 0x475   : > { %v1041_v26 = vpop.f32.mrf.mxu2 }
 0x476   : > { %v1045_v27 = vpack.c.bf16 %v1041_v26, %v1041_v26 }
 0x478   : > { %1543 = vmatmul.msk.bf16.vlgmr.msra.gmra.mxu0 %vm927_vm6, %v1045_v27 }
 0x47d   : > { %v1043_v28 = vpop.f32.mrf.mxu2 }
 0x4d1   : > { %v1075_v29 = vpop.f32.mrf.mxu1 }
 0x4d9   : > { %v1077_v30 = vpop.f32.mrf.mxu1 }
 0x4f5   : > { %v1059_v31 = vpop.f32.mrf.mxu0 }
 0x4f6   : > { %v1076_v32 = vadd.f32 %v1075_v29, %v1059_v31  ;;  %v1675_v31 = vld [vmem:[%s840_s17] ss:$0 sm:$0xff] }
 0x4f8   : > { %v1079_v34 = vadd.f32 %v1076_v32, %v2150_v1  ;;  %v1120_v1 = vld [vmem:[%s2127_s11 + $0x10] sm:$0xff]  ;;  %s2489_s11 = sld [smem:[#allocation41_spill]] (!%p1546_p8) }
 0x4f9   : > { %v1123_v44 = vpack.c.bf16 %v1121_v43, %v1120_v1 }
 0x4fa   : > { %v2206_v35 = vadd.f32 %v1671_v33, %v1079_v34 }
 0x4fb   : > { %1137 = vmatpush.bf16.msrb.mxu3 %v1123_v44 }
 0x4fc   : > { %v1087_v36 = vsel %vm852_vm1, %v2206_v35, 0.0 }
 0x4fd   : > { %1088 = vadd.xlane.f32.xlu0 %v1087_v36  ;;  %v1061_v37 = vpop.f32.mrf.mxu0 }
 0x4ff   : > { %1138 = vmatpush.bf16.msrb.mxu3 %v1122_v47 }
 0x570   : > { %v1089_v38 = vpop.xlane.xlu0 %1088 }
 0x571   : > { %v1090_v39 = vmul.f32 %v1089_v38, %v2154_v9 }
 0x573   : > { %v1091_v40 = vsub.f32 %v2206_v35, %v1090_v39 }
 0x575   : > { %v1092_v41 = vmul.f32 %v1091_v40, %v1091_v40 }
 0x577   : > { %v1093_v42 = vsel %vm852_vm1, %v1092_v41, 0.0 }
 0x578   : > { %1094 = vadd.xlane.f32.xlu1 %v1093_v42 }
 0x5eb   : > { %v1095_v51 = vpop.xlane.xlu1 %1094 }
 0x5ec   : > { %v1096_v54 = vmul.f32 %v1095_v51, %v2154_v9 }
 0x5ee   : > { %v1097_v56 = vadd.f32 1e-05, %v1096_v54 }
 0x5f0   : > { %1688 = vrsqrt.f32 %v1097_v56  ;;  %vm1104_vm10 = vweird.f32 %v1097_v56 }
 0x5f6   : > { %v1689_v63 = vpop.eup %1688 }
 0x5f7   : > { %v1099_v3 = vmul.f32 %v1689_v63, %v1097_v56  ;;  %vm1105_vm9 = vweird.f32 %v1689_v63 }
 0x5f8   : > { %vm1106_vm11 = vmor %vm1104_vm10, %vm1105_vm9 }
 0x5f9   : > { %v1100_v9 = vmul.f32 %v1689_v63, %v1099_v3 }
 0x5fb   : > { %v1101_v7 = vmul.f32 0.5, %v1100_v9 }
 0x5fd   : > { %v1102_v8 = vsub.f32 1.5, %v1101_v7 }
 0x5ff   : > { %v1103_v11 = vmul.f32 %v1689_v63, %v1102_v8 }
 0x601   : > { %v1107_v13 = vsel %vm1106_vm11, %v1689_v63, %v1103_v11 }
 0x602   : > { %v1108_v14 = vmul.f32 %v1107_v13, %v1091_v40 }
 0x604   : > { %v1112_v16 = vmul.f32 %v1672_v12, %v1108_v14 }
 0x606   : > { %v1116_v17 = vadd.f32 %v1673_v15, %v1112_v16 }
 0x608   : > { %v1117_v18 = vpack.c.bf16 %v1116_v17, %v1116_v17 }
 0x60a   : > { %1545 = vmatmul.msk.bf16.vlgmr.msrb.gmra.mxu3 %vm852_vm1, %v1117_v18 }
 0x68d   : > { %v1140_v26 = vpop.f32.mrf.mxu3 }
 0x68e   : > { %v1141_v27 = vadd.f32 %v1674_v25, %v1140_v26 }
 0x690   : > { %v1144_v28 = vmax.f32 %v1141_v27, 0.0 }
 0x692   : > { %v1145_v29 = vpack.c.bf16 %v1144_v28, %v1144_v28 }
 0x694   : > { %1182 = vmatmul.bf16.vlgmr.msrb.gmra.mxu2 %v1145_v29 }
 0x695   : > { %v1142_v30 = vpop.f32.mrf.mxu3 }
 0x717   : > { %v1183_v32 = vpop.f32.mrf.mxu2 }
 0x718   : > { %v1184_v33 = vadd.f32 %v1675_v31, %v1183_v32 }
 0x71a   : > { %v1187_v34 = vadd.f32 %v1184_v33, %v2206_v35 }
 0x71b   : > { %1192 = sbr.rel (%p1546_p8) target bundleno = 2115 (0x843), region = 104 }
 0x71c   : > { %1188 = vst.msk [vmem:[#allocation2] sm:$0xff] %vm852_vm1, %v1187_v34 }
 0x71f   : > { %v1185_v36 = vpop.f32.mrf.mxu2 }
 0x720   : > { %v1211_v37 = vld [vmem:[%s2482_s4 + $0x10] sm:$0xff]  ;;  %v1212_v38 = vld [vmem:[%s2483_s13 + $0x18] sm:$0xff]  ;;  %v1209_v39 = vld [vmem:[%s2483_s13] sm:$0xff]  ;;  %v1193_v35 = vsel %vm852_vm1, %v1187_v34, 0.0  ;;  %v1850_v1 = vmov 8.0  }
 0x721   : > { %v1214_v40 = vpack.c.bf16 %v1212_v38, %v1211_v37  ;;  %v1210_v41 = vld [vmem:[%s2483_s13 + $0x8] sm:$0xff]  ;;  %v1194_v42 = vrot.slane %v1193_v35, 4  ;;  %1690 = vrcp.f32 %v1850_v1  ;;  %v1240_v57 = vld [vmem:[%s2484_s3 + $0x10] sm:$0xff]  ;;  %v1241_v58 = vld [vmem:[%s2485_s20 + $0x18] sm:$0xff] }
 0x722   : > { %v1213_v43 = vpack.c.bf16 %v1210_v41, %v1209_v39  ;;  %v1243_v59 = vpack.c.bf16 %v1241_v58, %v1240_v57  ;;  %v1238_v60 = vld [vmem:[%s2485_s20] sm:$0xff]  ;;  %v1239_v61 = vld [vmem:[%s2485_s20 + $0x8] sm:$0xff] }
 0x723   : > { %1225 = vmatpush.bf16.msra.mxu0 %v1214_v40  ;;  %v1195_v44 = vadd.f32 %v1194_v42, %v1193_v35  ;;  %v1242_v62 = vpack.c.bf16 %v1239_v61, %v1238_v60  ;;  %v1215_v63 = vld [vmem:[%s2486_s26] sm:$0x1] }
 0x724   : > { %1254 = vmatpush.bf16.msra.mxu1 %v1243_v59  ;;  %v1232_v2 = vld [vmem:[%s2487_s19] sm:$0x1] }
 0x725   : > { %v1196_v45 = vrot.slane %v1195_v44, 2  ;;  %v1234_v9 = vld [vmem:[%s2488_s18] sm:$0x1] }
 0x726   : > { %v1244_v10 = vld [vmem:[%s2489_s11] sm:$0x1] }
 0x727   : > { %v1691_v46 = vpop.eup %1690  ;;  %1226 = vmatpush.bf16.msra.mxu0 %v1213_v43  ;;  %v1197_v47 = vadd.f32 %v1196_v45, %v1195_v44 }
 0x728   : > { %v1201_v48 = vmul.f32 8.0, %v1691_v46  ;;  %vm1205_vm12 = vweird.f32 %v1691_v46  ;;  %1255 = vmatpush.bf16.msra.mxu1 %v1242_v62 }
 0x729   : > { %v1198_v49 = vrot.slane %v1197_v47, 1 }
 0x72a   : > { %v1202_v50 = vsub.f32 1.0, %v1201_v48 }
 0x72b   : > { %v1199_v52 = vadd.f32 %v1198_v49, %v1197_v47 }
 0x72c   : > { %v1203_v51 = vmul.f32 %v1691_v46, %v1202_v50 }
 0x72e   : > { %v1204_v53 = vadd.f32 %v1691_v46, %v1203_v51 }
 0x730   : > { %v1206_v54 = vsel %vm1205_vm12, %v1691_v46, %v1204_v53 }
 0x731   : > { %v1207_v55 = vmul.f32 %v1206_v54, %v1199_v52 }
 0x733   : > { %v1208_v56 = vpack.c.bf16 %v1207_v55, %v1207_v55 }
 0x735   : > { %1547 = vmatmul.msk.bf16.vlgmr.msra.gmra.mxu0 %vm852_vm1, %v1208_v56 }
 0x7b2   : > { %v1228_v0 = vpop.f32.mrf.mxu0 }
 0x7b3   : > { %v1229_v3 = vadd.f32 %v1228_v0, %v1215_v63 }
 0x7b5   : > { %v1233_v4 = vmul.f32 %v1232_v2, %v1229_v3 }
 0x7b7   : > { %v1235_v5 = vadd.f32 %v1234_v9, %v1233_v4 }
 0x7b9   : > { %v1236_v6 = vmax.f32 %v1235_v5, 0.0 }
 0x7ba   : > { %v1230_v7 = vpop.f32.mrf.mxu0 }
 0x7bb   : > { %v1237_v8 = vpack.c.bf16 %v1236_v6, %v1236_v6 }
 0x7bd   : > { %1548 = vmatmul.msk.bf16.vlgmr.msra.gmra.mxu1 %vm852_vm1, %v1237_v8 }
 0x83a   : > { %v1257_v11 = vpop.f32.mrf.mxu1 }
 0x83b   : > { %v1258_v12 = vadd.f32 %v1257_v11, %v1244_v10 }
 0x83d   : > { %1261 = vst [vmem:[%s2147_s0] sm:$0x1] %v1258_v12 }
 0x842   : > { %v1259_v13 = vpop.f32.mrf.mxu1 }
 0x843 PF: > { %s2490_s3 = sld [smem:[#allocation15_spill]]  ;;  %s1281_s23 = sshll.u32 %s2143_s2, 4  ;;  %s1282_s23 = int_to_ptr.vmem [resolvable:$true] %s1281_s23 }
 0x844   : > { %s2491_s21 = sld [smem:[#allocation14_spill]] }
 0x845   : > { %s2492_s25 = sld [smem:[#allocation12_spill]] }
 0x846   : > { %s2494_s15 = sld [smem:[#allocation42_spill]] }
 0x847   : > { %s2495_s14 = sld [smem:[#allocation43_spill]] }
 0x849   : > { %s1550_s1 = sshll.u32 %s2490_s3, 1 }
 0x84a   : > { %s1551_s30 = sshll.u32 %s2491_s21, 2 }
 0x84b   : > { %s1278_s16 = sadd.s32 %s1551_s30, %s1550_s1  ;;  %s2496_s11 = sand.u32 1, %s2492_s25  }
 0x84c   : > { %s1552_s27 = sshll.u32 %s1278_s16, 3  ;;  %s1263_s5 = scalar_lea.sflag [#allocation4], %s2496_s11 }
 0x84d   : > { %s1280_s19 = scalar_lea.hbm %s2494_s15, %s1552_s27  ;;  %s1295_s29 = scalar_lea.hbm %s2495_s14, %s2490_s3 }
 0x84e   : > { %s1283_s24 = sshll.u32 %s1280_s19, 4  ;;  %s1712_s1 = scalar_lea.hbm %s2494_s15, 64  ;;  %s1284_s24 = int_to_ptr.hbm [resolvable:$true] %s1283_s24 }
 0x84f   : > { %s1706_s6 = sshra.s32 %s1284_s24, 4  ;;  %s1707_s6 = int_to_ptr.hbm [resolvable:$true] %s1706_s6 }
 0x850   : > { %s1708_s7 = scalar_lea.hbm %s1707_s6, 16  ;;  %p1713_p0 = scmp.lt.s32.totalorder %s1707_s6, %s2494_s15 }
 0x851   : > { %p1709_p9 = scmp.ne.s32.totalorder %s1707_s6, %s1708_s7  ;;  %p1714_p1 = scmp.lt.s32.totalorder %s1712_s1, %s1708_s7 }
 0x853   : > { %p1710_p10 = pnand %p1709_p9, %p2031_p3  ;;  %p1715_p4 = por %p1714_p1, %p1713_p0 }
 0x855   : > { %p1711_p11 = pneg %p1710_p10 }
 0x857   : > { %p1716_p2 = pnand %p1715_p4, %p1711_p11 }
 0x859   : > { %1719 = shalt.err (!%p1716_p2)
}
 0x85a   : > { %s1851_s3 = smov 128   ;;  %s1852_s27 = smov 8  }
 0x85b   : > { %1559 = dma.vmem_to_hbm [thread:$0]  (%p2031_p3), %s1282_s23, 256, %s1284_s24, %s1263_s5, %s1851_s3, %s1851_s3, %s1852_s27  }
 0x85c   : > { %s1297_s26 = sshll.u32 %s2147_s0, 4  ;;  %s1299_s4 = sshll.u32 %s1295_s29, 4  ;;  %s1298_s26 = int_to_ptr.vmem [resolvable:$true] %s1297_s26  ;;  %s1300_s4 = int_to_ptr.hbm [resolvable:$true] %s1299_s4 }
 0x85d   : > { %s2498_s19 = sand.u32 1, %s1806_s22   ;;  %s1734_s18 = sshra.s32 %s1300_s4, 4  ;;  %s1735_s18 = int_to_ptr.hbm [resolvable:$true] %s1734_s18 }
 0x85e   : > { %s1268_s17 = scalar_lea.sflag [#allocation6], %s2498_s19  ;;  %s1736_s6 = scalar_lea.hbm %s1735_s18, 1 }
 0x85f   : > { %p1737_p5 = scmp.ne.s32.totalorder %s1735_s18, %s1736_s6  ;;  %s1740_s2 = scalar_lea.hbm %s2495_s14, 2 }
 0x860   : > { %p1741_p3 = scmp.lt.s32.totalorder %s1735_s18, %s2495_s14  ;;  %p1742_p9 = scmp.lt.s32.totalorder %s1740_s2, %s1736_s6 }
 0x861   : > { %p1738_p6 = pnand %p1737_p5, %p2058_p12 }
 0x862   : > { %p1743_p10 = por %p1742_p9, %p1741_p3 }
 0x863   : > { %p1739_p8 = pneg %p1738_p6 }
 0x865   : > { %p1744_p11 = pnand %p1743_p10, %p1739_p8 }
 0x867   : > { %1747 = shalt.err (!%p1744_p11)
}
 0x868   : > { %1560 = dma.vmem_to_hbm [thread:$0]  (%p2058_p12), %s1298_s26, 16, %s1300_s4, %s1268_s17  }
 0x869 PF: > { %s2499_s5 = sld [smem:[#allocation18_spill]] }
 0x86a   : > { %s2500_s0 = sld [smem:[#allocation11_spill]] }
 0x86f   : > { %p1570_p0 = scmp.ge.s32.totalorder %s2499_s5, 2 }
 0x870   : > { %s1311_s24 = sand.u32 1, %s2500_s0  }
 0x871   : > { %p1564_p1 = pnand %p1570_p0, %p2046_p7  ;;  %s1312_s29 = scalar_lea.sflag [#allocation4], %s1311_s24 }
 0x873   : > { %p1565_p4 = pneg %p1564_p1 }
 0x875   : > { %1793 = dma.done.wait (%p1565_p4), %s1312_s29, 256  }
 0x876   : > { %1795 = vsyncadd (%p1565_p4), %s1312_s29, 4294967040  ;;  %s2502_s1 = sld [smem:[#allocation9_spill]]  ;;  %p1567_p2 = pnand %p1570_p0, %p2070_p13 }
 0x878   : > { %p1568_p5 = pneg %p1567_p2 }
 0x87c   : > { %s1321_s16 = sand.u32 1, %s2502_s1  }
 0x87d   : > { %s1322_s3 = scalar_lea.sflag [#allocation6], %s1321_s16 }
 0x87e   : > { %1797 = dma.done.wait (%p1568_p5), %s1322_s3, 16  }
 0x87f   : > { %1799 = vsyncadd (%p1568_p5), %s1322_s3, 4294967280  ;;  %s37_s4 = sadd.s32 1, %s2499_s5   ;;  %s2504_s25 = sld [smem:[#allocation10_spill]] }
 0x880   : > { %p34_p12 = scmp.ge.s32.totalorder %s37_s4, 6   ;;  %s2505_s23 = sld [smem:[#allocation24_spill]] }
 0x881   : > { %s2506_s24 = sld [smem:[#allocation12_spill]]  ;;  %s2513_s1 = smov %s1806_s22 }
 0x882   : > { %s2507_s2 = sld [smem:[#allocation13_spill]] }
 0x883   : > { %s2508_s27 = sld [smem:[#allocation25_spill]] }
 0x884   : > { %s2509_s3 = sld [smem:[#allocation16_spill]] }
 0x885   : > { %s2510_s26 = sld [smem:[#allocation17_spill]]  ;;  %s2514_s22 = smov %s2504_s25 }
 0x886   : > { %s2511_s19 = sld [smem:[#allocation19_spill]] }
 0x887   : > { %s2512_s28 = sld [smem:[#allocation21_spill]] }
 0x888   :  { %36 = sbr.rel (!%p34_p12) target bundleno = 27 (0x1b), region = 193 }
 0x889   : > { %s2515_s25 = smov %s2508_s27 }
 0x88c   : > { %s2516_s27 = smov %s2511_s19 }
 0x88d   :  { %1327 = vsyncpa [#allocation4], 1 }
 0x88e   :  { %1329 = vsyncpa [#allocation4 + $0x1], 1 }
 0x88f   :  { %1330 = vsyncpa [#allocation6], 1 }
 0x890   :  { %1332 = vsyncpa [#allocation6 + $0x1], 1 }

</bundles_post_ra>
